<compile_context>
chip_gen: v7x
topology: tpu7x:2x2x1
jax: 0.10.0
libtpu: 0.0.40
codegen_flags: <defaults>
</compile_context>

<pallas_src>
import functools

import numpy as np
import jax
import jax.numpy as jnp
from jax.experimental import pallas as pl
from jax.experimental.pallas import tpu as pltpu

EPS = 1e-6               # LayerNormalization eps (eps added to std)
NEG_INF = -1e9           # masked_fill value
WEIGHT_DTYPE = jnp.bfloat16    # MXU-native weights (halves weight DMA bytes)
COMPUTE_DTYPE = jnp.bfloat16   # MXU operand dtype; accumulation stays f32
ACT_DTYPE = jnp.float32        # inter-kernel activations kept f32 for accuracy


def _default_vmem_limit():
    # ~75% of physical VMEM, capped at 100 MiB: ~96 MiB on v5e/v6e (128 MiB
    # phys), ~48 MiB on v7x (64 MiB phys).  Conservative fallback if the query
    # is unavailable.
    try:
        cap = pltpu.get_tpu_info().vmem_capacity_bytes
        return min(int(cap) * 3 // 4, 100 * 1024 * 1024)
    except Exception:
        return 48 * 1024 * 1024


VMEM_LIMIT = _default_vmem_limit()
MAX_TM = 512 if VMEM_LIMIT >= 80 * 1024 * 1024 else 256   # matmul row-tile cap
MAX_TN = 512                                              # matmul col-tile cap
MAX_TQ = 256                                              # attention Sq-tile cap


# --------------------------------------------------------------------------
# Tiling helpers
# --------------------------------------------------------------------------
def _col_tile(n, cap):
    """Largest lane-dense divisor tile (multiple of 128) <= cap, else full dim."""
    if n <= cap:
        return n
    t = (cap // 128) * 128
    while t >= 128:
        if n % t == 0:
            return t
        t -= 128
    return n   # TODO(synk): pad + mask ragged column counts instead of one full block


def _div_tile(n, cap, quantum):
    """Largest divisor tile (multiple of quantum) <= cap, else full dim."""
    if n <= cap:
        return n
    t = (cap // quantum) * quantum
    while t >= quantum:
        if n % t == 0:
            return t
        t -= quantum
    return n


def _row_tile(n, cap):
    """Return (row_tile, padded_row_count): rows are padded to the tile
    quantum rather than falling back to one ragged full-size block."""
    if n <= cap:
        pn = -(-n // 8) * 8
        return pn, pn
    t = (cap // 8) * 8
    while t >= 8:
        if n % t == 0:
            return t, n
        t -= 8
    pn = -(-n // cap) * cap
    return cap, pn


# --------------------------------------------------------------------------
# Kernels
# --------------------------------------------------------------------------
def _fused_matmul_kernel_factory(has_ln, has_bias, has_res, activation,
                                 has_out_ln):
    """Kernel computing: [LN(x)] @ W [+bias] [relu] [+residual] [then LN]."""

    def kernel(*refs):
        idx = 0
        x_ref = refs[idx]; idx += 1
        if has_ln:
            ln_a_ref = refs[idx]; ln_b_ref = refs[idx + 1]; idx += 2
        w_ref = refs[idx]; idx += 1
        bias_ref = None
        if has_bias:
            bias_ref = refs[idx]; idx += 1
        res_ref = None
        if has_res:
            res_ref = refs[idx]; idx += 1
        if has_out_ln:
            oln_a_ref = refs[idx]; oln_b_ref = refs[idx + 1]; idx += 2
        o_ref = refs[idx]; idx += 1
        xn_ref = refs[idx] if has_ln else None          # VMEM scratch

        if has_ln:
            # Compute LN of the row tile only at the first column tile and
            # cache it; the remaining dout/tn column tiles of the same row
            # tile reuse the cached result (j is the inner, "arbitrary" axis).
            @pl.when(pl.program_id(1) == 0)
            def _():
                x = x_ref[...]                           # (tm, Din), f32
                dd = x.shape[-1]
                mean = jnp.mean(x, axis=-1, keepdims=True)
                # torch.std default is unbiased (ddof=1); eps added to std.
                var = jnp.sum((x - mean) ** 2, axis=-1, keepdims=True) / (dd - 1)
                inv = pl.reciprocal(jnp.sqrt(var) + EPS, approx=True)
                xn_ref[...] = ln_a_ref[...] * (x - mean) * inv + ln_b_ref[...]
            x = xn_ref[...]
        else:
            x = x_ref[...]

        y = jnp.dot(x.astype(COMPUTE_DTYPE),
                    w_ref[...].astype(COMPUTE_DTYPE),
                    preferred_element_type=jnp.float32)  # (tm, tn) f32 accum
        if has_bias:
            y = y + bias_ref[...]
        if activation == "relu":
            y = jnp.maximum(y, 0.0)
        if has_res:
            y = y + res_ref[...]
        if has_out_ln:
            dd = y.shape[-1]
            mean = jnp.mean(y, axis=-1, keepdims=True)
            var = jnp.sum((y - mean) ** 2, axis=-1, keepdims=True) / (dd - 1)
            inv = pl.reciprocal(jnp.sqrt(var) + EPS, approx=True)
            y = oln_a_ref[...] * (y - mean) * inv + oln_b_ref[...]
        o_ref[...] = y.astype(o_ref.dtype)

    return kernel


def layernorm_kernel(x_ref, a_ref, b_ref, o_ref):
    # Standalone LN; only used if the decoder stack has zero layers.
    x = x_ref[...]
    d = x.shape[-1]
    mean = jnp.mean(x, axis=-1, keepdims=True)
    var = jnp.sum((x - mean) ** 2, axis=-1, keepdims=True) / (d - 1)
    inv = pl.reciprocal(jnp.sqrt(var) + EPS, approx=True)
    o_ref[...] = (a_ref[...] * (x - mean) * inv + b_ref[...]).astype(o_ref.dtype)


def _attention_kernel_factory(*, num_heads, scale, causal, has_mask):
    """Per-(batch, Sq-tile) attention with heads sliced on the lane axis.

    Blocks: q (1, tq, D), kv (1, Sk, 2D) with K on lanes [:D] and V on [D:],
    optional mask (1, 1, tq|1, Sk) float 0/1."""

    def kernel(*refs):
        idx = 0
        q_ref = refs[idx]; idx += 1
        kv_ref = refs[idx]; idx += 1
        m_ref = None
        if has_mask:
            m_ref = refs[idx]; idx += 1
        o_ref = refs[idx]

        q = q_ref[0]                      # (tq, D)
        kv = kv_ref[0]                    # (Sk, 2D)
        tq, d = q.shape
        sk = kv.shape[0]
        dk = d // num_heads

        # Additive attention bias, computed once and shared across heads.
        bias = None
        if has_mask:
            m = m_ref[0, 0]               # (tq or 1, Sk)
            bias = jnp.where(m == 0.0, jnp.float32(NEG_INF), jnp.float32(0.0))
        if causal:
            row0 = pl.program_id(1) * tq
            rows = row0 + jax.lax.broadcasted_iota(jnp.int32, (tq, sk), 0)
            cols = jax.lax.broadcasted_iota(jnp.int32, (tq, sk), 1)
            cb = jnp.where(rows >= cols, jnp.float32(0.0), jnp.float32(NEG_INF))
            bias = cb if bias is None else bias + cb

        # Per-head attention; head h lives on lanes [h*dk, (h+1)*dk).
        for h in range(num_heads):
            qh = jax.lax.slice_in_dim(q, h * dk, (h + 1) * dk, axis=1)
            kh = jax.lax.slice_in_dim(kv, h * dk, (h + 1) * dk, axis=1)
            vh = jax.lax.slice_in_dim(kv, d + h * dk, d + (h + 1) * dk, axis=1)
            s = jax.lax.dot_general(
                qh.astype(COMPUTE_DTYPE), kh.astype(COMPUTE_DTYPE),
                (((1,), (1,)), ((), ())),
                preferred_element_type=jnp.float32) * scale
            if bias is not None:
                s = s + bias
            s_max = jnp.max(s, axis=-1, keepdims=True)
            p = jnp.exp(s - s_max)
            p = p * pl.reciprocal(jnp.sum(p, axis=-1, keepdims=True), approx=True)
            oh = jnp.dot(p.astype(COMPUTE_DTYPE), vh.astype(COMPUTE_DTYPE),
                         preferred_element_type=jnp.float32)
            # Write each head directly into its lane slice of the output block.
            o_ref[0, :, h * dk:(h + 1) * dk] = oh.astype(o_ref.dtype)

    return kernel
    # TODO(synk): for long Sk add flash-style Sk tiling with online-softmax scratch.


# --------------------------------------------------------------------------
# Pallas wrappers
# --------------------------------------------------------------------------
def fused_matmul(x2d, w, *, ln=None, bias=None, residual=None,
                 activation="none", out_ln=None):
    """[LN(x)] @ W [+bias] [relu] [+residual] [then LN], M/N-tiled on the MXU."""
    n, din = x2d.shape
    dout = w.shape[1]
    tm, n_pad = _row_tile(n, MAX_TM)
    # out_ln reduces over the full output feature dim -> need one column tile.
    tn = dout if out_ln is not None else _col_tile(dout, MAX_TN)
    if n_pad != n:
        x2d = jnp.pad(x2d, ((0, n_pad - n), (0, 0)))
        if residual is not None:
            residual = jnp.pad(residual, ((0, n_pad - n), (0, 0)))
    grid = (n_pad // tm, dout // tn)

    in_specs = [pl.BlockSpec((tm, din), lambda i, j: (i, 0))]
    args = [x2d]
    if ln is not None:
        a, b = ln
        in_specs += [pl.BlockSpec((1, din), lambda i, j: (0, 0)),
                     pl.BlockSpec((1, din), lambda i, j: (0, 0))]
        args += [a.reshape(1, din).astype(jnp.float32),
                 b.reshape(1, din).astype(jnp.float32)]
    in_specs += [pl.BlockSpec((din, tn), lambda i, j: (0, j))]
    args += [w]
    if bias is not None:
        in_specs += [pl.BlockSpec((1, tn), lambda i, j: (0, j))]
        args += [bias.reshape(1, dout).astype(jnp.float32)]
    if residual is not None:
        in_specs += [pl.BlockSpec((tm, tn), lambda i, j: (i, j))]
        args += [residual]
    if out_ln is not None:
        a, b = out_ln
        in_specs += [pl.BlockSpec((1, tn), lambda i, j: (0, j)),
                     pl.BlockSpec((1, tn), lambda i, j: (0, j))]
        args += [a.reshape(1, dout).astype(jnp.float32),
                 b.reshape(1, dout).astype(jnp.float32)]

    scratch = [pltpu.VMEM((tm, din), jnp.float32)] if ln is not None else []
    # With the LN scratch keyed on j==0, keep j iteration local to a core.
    sem = ("parallel", "arbitrary") if ln is not None else ("parallel", "parallel")

    kern = _fused_matmul_kernel_factory(ln is not None, bias is not None,
                                        residual is not None, activation,
                                        out_ln is not None)
    out = pl.pallas_call(
        kern,
        out_shape=jax.ShapeDtypeStruct((n_pad, dout), ACT_DTYPE),
        grid=grid,
        in_specs=in_specs,
        out_specs=pl.BlockSpec((tm, tn), lambda i, j: (i, j)),
        scratch_shapes=scratch,
        compiler_params=pltpu.CompilerParams(
            dimension_semantics=sem,
            vmem_limit_bytes=VMEM_LIMIT),
    )(*args)
    if n_pad != n:
        out = out[:n]
    return out
    # TODO(synk): add a K (Din) reduction grid axis with an f32 accumulator for
    # huge Din on v7x (conflicts with the in-prologue LN which needs full rows).


def layernorm(x2d, alpha, bias):
    n, d = x2d.shape
    tm, n_pad = _row_tile(n, MAX_TM)
    if n_pad != n:
        x2d = jnp.pad(x2d, ((0, n_pad - n), (0, 0)))
    out = pl.pallas_call(
        layernorm_kernel,
        out_shape=jax.ShapeDtypeStruct((n_pad, d), ACT_DTYPE),
        grid=(n_pad // tm,),
        in_specs=[pl.BlockSpec((tm, d), lambda i: (i, 0)),
                  pl.BlockSpec((1, d), lambda i: (0, 0)),
                  pl.BlockSpec((1, d), lambda i: (0, 0))],
        out_specs=pl.BlockSpec((tm, d), lambda i: (i, 0)),
        compiler_params=pltpu.CompilerParams(
            dimension_semantics=("parallel",),
            vmem_limit_bytes=VMEM_LIMIT),
    )(x2d, alpha.reshape(1, d).astype(jnp.float32),
      bias.reshape(1, d).astype(jnp.float32))
    return out[:n] if n_pad != n else out


def scaled_dot_attention(q, kv, num_heads, *, mask=None, causal=False):
    """q: (B, Sq, D), kv: (B, Sk, 2D) with K on lanes [:D] and V on [D:].
    mask: None, (B,1,1,Sk) padding, or (B,1,Sq,Sk) dense float 0/1 mask."""
    b, sq, d = q.shape
    sk = kv.shape[1]
    kvw = kv.shape[2]
    assert d % num_heads == 0
    dk = d // num_heads
    tq = _div_tile(sq, MAX_TQ, 8)
    grid = (b, sq // tq)

    in_specs = [pl.BlockSpec((1, tq, d), lambda bi, qi: (bi, qi, 0)),
                pl.BlockSpec((1, sk, kvw), lambda bi, qi: (bi, 0, 0))]
    args = [q, kv]
    if mask is not None:
        if mask.shape[2] == 1:   # padding mask, broadcast over query rows
            in_specs.append(pl.BlockSpec((1, 1, 1, sk),
                                         lambda bi, qi: (bi, 0, 0, 0)))
        else:                    # dense mask, tiled over Sq
            in_specs.append(pl.BlockSpec((1, 1, tq, sk),
                                         lambda bi, qi: (bi, 0, qi, 0)))
        args.append(mask)

    kern = _attention_kernel_factory(num_heads=num_heads,
                                     scale=1.0 / float(np.sqrt(dk)),
                                     causal=causal, has_mask=mask is not None)
    return pl.pallas_call(
        kern,
        out_shape=jax.ShapeDtypeStruct((b, sq, d), ACT_DTYPE),
        grid=grid,
        in_specs=in_specs,
        out_specs=pl.BlockSpec((1, tq, d), lambda bi, qi: (bi, qi, 0)),
        compiler_params=pltpu.CompilerParams(
            dimension_semantics=("parallel", "parallel"),
            vmem_limit_bytes=VMEM_LIMIT),
    )(*args)


# --------------------------------------------------------------------------
# Decoder forward built out of the fused Pallas kernels
# --------------------------------------------------------------------------
def decoder_block(p, x2d, enc2d, b, s, s_src, d, src_mask, num_heads,
                  *, tgt_mask=None, tgt_is_causal=True, out_ln=None):
    # ---- residual 1: pre-norm self-attention.  LN fused into a single
    #      concatenated QKV projection; residual fused into the Wo epilogue. ----
    sa = p["self_attn"]
    qkv = fused_matmul(x2d, sa["wqkv"], ln=(p["ln1_a"], p["ln1_b"]))  # (n, 3D)
    qkv = qkv.reshape(b, s, 3 * d)
    ctx = scaled_dot_attention(qkv[..., :d], qkv[..., d:], num_heads,
                               mask=None if tgt_is_causal else tgt_mask,
                               causal=tgt_is_causal)
    x2d = fused_matmul(ctx.reshape(b * s, d), sa["wo"], residual=x2d)

    # ---- residual 2: cross-attention against encoder output ----
    ca = p["cross_attn"]
    q = fused_matmul(x2d, ca["wq"], ln=(p["ln2_a"], p["ln2_b"]))
    kv = fused_matmul(enc2d, ca["wkv"])                 # encoder not normed here
    ctx = scaled_dot_attention(q.reshape(b, s, d), kv.reshape(b, s_src, 2 * d),
                               num_heads, mask=src_mask)
    x2d = fused_matmul(ctx.reshape(b * s, d), ca["wo"], residual=x2d)

    # ---- residual 3: position-wise feed-forward (LN fused into w1; residual
    #      and, for the last block, the final LayerNorm fused into w2) ----
    h = fused_matmul(x2d, p["w1"], ln=(p["ln3_a"], p["ln3_b"]),
                     bias=p["b1"], activation="relu")
    x2d = fused_matmul(h, p["w2"], bias=p["b2"], residual=x2d, out_ln=out_ln)
    return x2d
    # TODO(synk): dropout inside ResidualConnection is inference-mode identity.


def decoder_forward(params, x, enc, src_mask, tgt_mask, *, num_heads,
                    tgt_is_causal=True):
    b, s, d = x.shape
    s_src = enc.shape[1]
    x2d = x.reshape(b * s, d)
    enc2d = enc.reshape(b * s_src, d)
    layers = params["layers"]
    if not layers:
        return layernorm(x2d, params["norm_a"], params["norm_b"]).reshape(b, s, d)
    for li, p in enumerate(layers):
        out_ln = ((params["norm_a"], params["norm_b"])
                  if li == len(layers) - 1 else None)
        x2d = decoder_block(p, x2d, enc2d, b, s, s_src, d, src_mask, num_heads,
                            tgt_mask=tgt_mask, tgt_is_causal=tgt_is_causal,
                            out_ln=out_ln)
    return x2d.reshape(b, s, d)


# --------------------------------------------------------------------------
# Pure-JAX reference (for correctness check only)
# --------------------------------------------------------------------------
def ref_layernorm(x, a, b):
    mean = x.mean(-1, keepdims=True)
    var = ((x - mean) ** 2).sum(-1, keepdims=True) / (x.shape[-1] - 1)
    return a * (x - mean) / (jnp.sqrt(var) + EPS) + b


def ref_mha(p, q_in, kv_in, mask, h):
    bsz, sq, d = q_in.shape
    sk = kv_in.shape[1]
    dk = d // h
    wq = p["wq"].astype(jnp.float32); wk = p["wk"].astype(jnp.float32)
    wv = p["wv"].astype(jnp.float32); wo = p["wo"].astype(jnp.float32)
    q = (q_in @ wq).reshape(bsz, sq, h, dk).transpose(0, 2, 1, 3)
    k = (kv_in @ wk).reshape(bsz, sk, h, dk).transpose(0, 2, 1, 3)
    v = (kv_in @ wv).reshape(bsz, sk, h, dk).transpose(0, 2, 1, 3)
    s = jnp.einsum("bhqd,bhkd->bhqk", q, k) / np.sqrt(dk)
    s = jnp.where(mask == 0.0, NEG_INF, s)
    a = jax.nn.softmax(s, -1)
    ctx = jnp.einsum("bhqk,bhkd->bhqd", a, v).transpose(0, 2, 1, 3)
    return ctx.reshape(bsz, sq, d) @ wo


def ref_decoder(params, x, enc, src_mask, tgt_mask, h):
    for p in params["layers"]:
        n1 = ref_layernorm(x, p["ln1_a"], p["ln1_b"])
        x = x + ref_mha(p["self_attn"], n1, n1, tgt_mask, h)
        n2 = ref_layernorm(x, p["ln2_a"], p["ln2_b"])
        x = x + ref_mha(p["cross_attn"], n2, enc, src_mask, h)
        n3 = ref_layernorm(x, p["ln3_a"], p["ln3_b"])
        ff = (jnp.maximum(n3 @ p["w1"].astype(jnp.float32) + p["b1"], 0.0)
              @ p["w2"].astype(jnp.float32) + p["b2"])
        x = x + ff
    return ref_layernorm(x, params["norm_a"], params["norm_b"])


# --------------------------------------------------------------------------
# Deterministic parameter init (synthetic; shapes follow the nn.Module __init__)
# --------------------------------------------------------------------------
def _init_w(key, din, dout):
    bound = 1.0 / np.sqrt(din)
    return jax.random.uniform(key, (din, dout), jnp.float32, -bound, bound)


def _attn_params(keys, d_model):
    wq = _init_w(keys[0], d_model, d_model).astype(WEIGHT_DTYPE)
    wk = _init_w(keys[1], d_model, d_model).astype(WEIGHT_DTYPE)
    wv = _init_w(keys[2], d_model, d_model).astype(WEIGHT_DTYPE)
    wo = _init_w(keys[3], d_model, d_model).astype(WEIGHT_DTYPE)
    return {"wq": wq, "wk": wk, "wv": wv, "wo": wo,
            "wkv": jnp.concatenate([wk, wv], axis=1),      # fused K|V (cross)
            "wqkv": jnp.concatenate([wq, wk, wv], axis=1)}  # fused Q|K|V (self)


def init_params(key, num_layers, d_model, d_ff):
    layers = []
    for _ in range(num_layers):
        key, *ks = jax.random.split(key, 13)
        layers.append({
            "self_attn": _attn_params(ks[0:4], d_model),
            "cross_attn": _attn_params(ks[4:8], d_model),
            "w1": _init_w(ks[8], d_model, d_ff).astype(WEIGHT_DTYPE),
            "b1": jax.random.uniform(ks[9], (d_ff,), jnp.float32, -0.1, 0.1),
            "w2": _init_w(ks[10], d_ff, d_model).astype(WEIGHT_DTYPE),
            "b2": jax.random.uniform(ks[11], (d_model,), jnp.float32, -0.1, 0.1),
            # LayerNormalization params init to ones / zeros (as in __init__)
            "ln1_a": jnp.ones((d_model,), jnp.float32),
            "ln1_b": jnp.zeros((d_model,), jnp.float32),
            "ln2_a": jnp.ones((d_model,), jnp.float32),
            "ln2_b": jnp.zeros((d_model,), jnp.float32),
            "ln3_a": jnp.ones((d_model,), jnp.float32),
            "ln3_b": jnp.zeros((d_model,), jnp.float32),
        })
    return {"layers": layers,
            "norm_a": jnp.ones((d_model,), jnp.float32),
            "norm_b": jnp.zeros((d_model,), jnp.float32)}


# --------------------------------------------------------------------------
if __name__ == "__main__":
    B, S_TGT, S_SRC, D, H, DFF, L = 2, 8, 8, 32, 4, 64, 2

    key = jax.random.PRNGKey(0)
    kx, ke, kp = jax.random.split(key, 3)
    x = jax.random.normal(kx, (B, S_TGT, D), jnp.float32)
    enc = jax.random.normal(ke, (B, S_SRC, D), jnp.float32)

    # target mask: causal; src mask: padding (batch 1 has last 2 tokens masked)
    causal = jnp.tril(jnp.ones((S_TGT, S_TGT), jnp.float32))
    tgt_mask = jnp.broadcast_to(causal[None, None], (B, 1, S_TGT, S_TGT))
    src_len = jnp.array([S_SRC, S_SRC - 2])
    src_mask = (jnp.arange(S_SRC)[None, :] < src_len[:, None]
                ).astype(jnp.float32).reshape(B, 1, 1, S_SRC)

    params = init_params(kp, L, D, DFF)

    fwd = jax.jit(functools.partial(decoder_forward, num_heads=H,
                                    tgt_is_causal=True))
    out = fwd(params, x, enc, src_mask, tgt_mask)
    out = jax.block_until_ready(out)

    ref = ref_decoder(params, x, enc, src_mask, tgt_mask, H)
    # bf16 MXU operands (f32 accumulation) -> loosened tolerance vs f32 reference
    np.testing.assert_allclose(np.asarray(out), np.asarray(ref),
                               rtol=5e-2, atol=5e-2)
    print("KERNEL_OK")
</pallas_src>

<mosaic_0001>
module attributes {stable_mosaic.version = 11 : i64} {
  func.func @kernel(%arg0: i32, %arg1: i32, %arg2: memref<16x32xf32, #tpu.memory_space<vmem>>, %arg3: memref<32x32xbf16, #tpu.memory_space<vmem>>, %arg4: memref<16x32xf32, #tpu.memory_space<vmem>>, %arg5: memref<16x32xf32, #tpu.memory_space<vmem>>) attributes {dimension_semantics = [#tpu.dimension_semantics<parallel>, #tpu.dimension_semantics<parallel>], iteration_bounds = array<i64: 1, 1>, scalar_prefetch = 0 : i64, scratch_operands = 0 : i64, tpu.core_type = #tpu.core_type<tc>, window_params = [{transform_indices = @transform_0, window_bounds = array<i64: 16, 32>}, {transform_indices = @transform_1, window_bounds = array<i64: 32, 32>}, {transform_indices = @transform_2, window_bounds = array<i64: 16, 32>}, {transform_indices = @transform_3, window_bounds = array<i64: 16, 32>}]} {
    %c0 = arith.constant 0 : index
    %c0_0 = arith.constant 0 : index
    %0 = vector.load %arg2[%c0, %c0_0] : memref<16x32xf32, #tpu.memory_space<vmem>>, vector<16x32xf32>
    %1 = arith.truncf %0 : vector<16x32xf32> to vector<16x32xbf16>
    %c0_1 = arith.constant 0 : index
    %c0_2 = arith.constant 0 : index
    %2 = vector.load %arg3[%c0_1, %c0_2] : memref<32x32xbf16, #tpu.memory_space<vmem>>, vector<32x32xbf16>
    %cst = arith.constant dense<0.000000e+00> : vector<16x32xf32>
    %3 = tpu.matmul %1, %2, %cst {dimension_numbers = #tpu.dot_dimension_numbers<[1], [0], [0], [1], [0, 0, 1, 1], [], []>} : vector<16x32xbf16>, vector<32x32xbf16>, vector<16x32xf32> -> vector<16x32xf32>
    %c0_3 = arith.constant 0 : index
    %c0_4 = arith.constant 0 : index
    %4 = vector.load %arg4[%c0_3, %c0_4] : memref<16x32xf32, #tpu.memory_space<vmem>>, vector<16x32xf32>
    %5 = arith.addf %3, %4 : vector<16x32xf32>
    %c0_5 = arith.constant 0 : index
    %c0_6 = arith.constant 0 : index
    %6 = vector.load %arg5[%c0_5, %c0_6] : memref<16x32xf32, #tpu.memory_space<vmem>>, vector<16x32xf32>
    tpu.vector_store %arg5[%c0_5, %c0_6], %5 {strides = array<i32>} : memref<16x32xf32, #tpu.memory_space<vmem>>, vector<16x32xf32>,
    return
  }
  func.func @transform_0(%arg0: i32, %arg1: i32) -> (i32, i32) {
    %c0_i32 = arith.constant 0 : i32
    %c0_i32_0 = arith.constant 0 : i32
    return %arg0, %c0_i32 : i32, i32
  }
  func.func @transform_1(%arg0: i32, %arg1: i32) -> (i32, i32) {
    %c0_i32 = arith.constant 0 : i32
    %c0_i32_0 = arith.constant 0 : i32
    return %c0_i32, %arg1 : i32, i32
  }
  func.func @transform_2(%arg0: i32, %arg1: i32) -> (i32, i32) {
    %c0_i32 = arith.constant 0 : i32
    return %arg0, %arg1 : i32, i32
  }
  func.func @transform_3(%arg0: i32, %arg1: i32) -> (i32, i32) {
    %c0_i32 = arith.constant 0 : i32
    return %arg0, %arg1 : i32, i32
  }
}

module attributes {stable_mosaic.version = 11 : i64} {
  func.func @kernel(%arg0: i32, %arg1: i32, %arg2: memref<16x32xf32, #tpu.memory_space<vmem>>, %arg3: memref<1x32xf32, #tpu.memory_space<vmem>>, %arg4: memref<1x32xf32, #tpu.memory_space<vmem>>, %arg5: memref<32x96xbf16, #tpu.memory_space<vmem>>, %arg6: memref<16x96xf32, #tpu.memory_space<vmem>>, %arg7: memref<16x32xf32, #tpu.memory_space<vmem>>) attributes {dimension_semantics = [#tpu.dimension_semantics<parallel>, #tpu.dimension_semantics<arbitrary>], iteration_bounds = array<i64: 1, 1>, scalar_prefetch = 0 : i64, scratch_operands = 1 : i64, tpu.core_type = #tpu.core_type<tc>, window_params = [{transform_indices = @transform_0, window_bounds = array<i64: 16, 32>}, {pipeline_mode = #tpu.pipeline_mode<synchronous>, transform_indices = @transform_1, window_bounds = array<i64: 1, 32>}, {pipeline_mode = #tpu.pipeline_mode<synchronous>, transform_indices = @transform_2, window_bounds = array<i64: 1, 32>}, {transform_indices = @transform_3, window_bounds = array<i64: 32, 96>}, {transform_indices = @transform_4, window_bounds = array<i64: 16, 96>}]} {
    %c0_i32 = arith.constant 0 : i32
    %0 = arith.cmpi eq, %arg1, %c0_i32 : i32
    %1 = arith.extui %0 : i1 to i32
    %c0_i32_0 = arith.constant 0 : i32
    %2 = arith.cmpi ne, %1, %c0_i32_0 : i32
    scf.if %2 {
      %c0_6 = arith.constant 0 : index
      %c0_7 = arith.constant 0 : index
      %8 = vector.load %arg2[%c0_6, %c0_7] : memref<16x32xf32, #tpu.memory_space<vmem>>, vector<16x32xf32>
      %cst_8 = arith.constant dense<0.000000e+00> : vector<16xf32>
      %9 = vector.multi_reduction <add>, %8, %cst_8 [1] : vector<16x32xf32> to vector<16xf32>
      %10 = vector.shape_cast %9 : vector<16xf32> to vector<16x1xf32>
      %cst_9 = arith.constant 3.200000e+01 : f32
      %11 = vector.broadcast %cst_9 : f32 to vector<16x1xf32>
      %12 = arith.divf %10, %11 : vector<16x1xf32>
      %13 = vector.broadcast %12 : vector<16x1xf32> to vector<16x32xf32>
      %14 = arith.subf %8, %13 : vector<16x32xf32>
      %15 = arith.mulf %14, %14 : vector<16x32xf32>
      %cst_10 = arith.constant dense<0.000000e+00> : vector<16xf32>
      %16 = vector.multi_reduction <add>, %15, %cst_10 [1] : vector<16x32xf32> to vector<16xf32>
      %17 = vector.shape_cast %16 : vector<16xf32> to vector<16x1xf32>
      %cst_11 = arith.constant 3.100000e+01 : f32
      %18 = vector.broadcast %cst_11 : f32 to vector<16x1xf32>
      %19 = arith.divf %17, %18 : vector<16x1xf32>
      %20 = math.sqrt %19 : vector<16x1xf32>
      %cst_12 = arith.constant 9.99999997E-7 : f32
      %21 = vector.broadcast %cst_12 : f32 to vector<16x1xf32>
      %22 = arith.addf %20, %21 : vector<16x1xf32>
      %23 = tpu.reciprocal %22 {approx = true} : vector<16x1xf32> -> vector<16x1xf32>
      %c0_13 = arith.constant 0 : index
      %c0_14 = arith.constant 0 : index
      %24 = vector.load %arg3[%c0_13, %c0_14] : memref<1x32xf32, #tpu.memory_space<vmem>>, vector<1x32xf32>
      %25 = vector.broadcast %12 : vector<16x1xf32> to vector<16x32xf32>
      %26 = arith.subf %8, %25 : vector<16x32xf32>
      %27 = vector.broadcast %24 : vector<1x32xf32> to vector<16x32xf32>
      %28 = arith.mulf %27, %26 : vector<16x32xf32>
      %29 = vector.broadcast %23 : vector<16x1xf32> to vector<16x32xf32>
      %30 = arith.mulf %28, %29 : vector<16x32xf32>
      %c0_15 = arith.constant 0 : index
      %c0_16 = arith.constant 0 : index
      %31 = vector.load %arg4[%c0_15, %c0_16] : memref<1x32xf32, #tpu.memory_space<vmem>>, vector<1x32xf32>
      %32 = vector.broadcast %31 : vector<1x32xf32> to vector<16x32xf32>
      %33 = arith.addf %30, %32 : vector<16x32xf32>
      %c0_17 = arith.constant 0 : index
      %c0_18 = arith.constant 0 : index
      %34 = vector.load %arg7[%c0_17, %c0_18] : memref<16x32xf32, #tpu.memory_space<vmem>>, vector<16x32xf32>
      tpu.vector_store %arg7[%c0_17, %c0_18], %33 {strides = array<i32>} : memref<16x32xf32, #tpu.memory_space<vmem>>, vector<16x32xf32>,
    } else {
    }
    %c0 = arith.constant 0 : index
    %c0_1 = arith.constant 0 : index
    %3 = vector.load %arg7[%c0, %c0_1] : memref<16x32xf32, #tpu.memory_space<vmem>>, vector<16x32xf32>
    %4 = arith.truncf %3 : vector<16x32xf32> to vector<16x32xbf16>
    %c0_2 = arith.constant 0 : index
    %c0_3 = arith.constant 0 : index
    %5 = vector.load %arg5[%c0_2, %c0_3] : memref<32x96xbf16, #tpu.memory_space<vmem>>, vector<32x96xbf16>
    %cst = arith.constant dense<0.000000e+00> : vector<16x96xf32>
    %6 = tpu.matmul %4, %5, %cst {dimension_numbers = #tpu.dot_dimension_numbers<[1], [0], [0], [1], [0, 0, 1, 1], [], []>} : vector<16x32xbf16>, vector<32x96xbf16>, vector<16x96xf32> -> vector<16x96xf32>
    %c0_4 = arith.constant 0 : index
    %c0_5 = arith.constant 0 : index
    %7 = vector.load %arg6[%c0_4, %c0_5] : memref<16x96xf32, #tpu.memory_space<vmem>>, vector<16x96xf32>
    tpu.vector_store %arg6[%c0_4, %c0_5], %6 {strides = array<i32>} : memref<16x96xf32, #tpu.memory_space<vmem>>, vector<16x96xf32>,
    return
  }
  func.func @transform_0(%arg0: i32, %arg1: i32) -> (i32, i32) {
    %c0_i32 = arith.constant 0 : i32
    %c0_i32_0 = arith.constant 0 : i32
    return %arg0, %c0_i32 : i32, i32
  }
  func.func @transform_1(%arg0: i32, %arg1: i32) -> (i32, i32) {
    %c0_i32 = arith.constant 0 : i32
    %c0_i32_0 = arith.constant 0 : i32
    %c0_i32_1 = arith.constant 0 : i32
    return %c0_i32, %c0_i32_0 : i32, i32
  }
  func.func @transform_2(%arg0: i32, %arg1: i32) -> (i32, i32) {
    %c0_i32 = arith.constant 0 : i32
    %c0_i32_0 = arith.constant 0 : i32
    %c0_i32_1 = arith.constant 0 : i32
    return %c0_i32, %c0_i32_0 : i32, i32
  }
  func.func @transform_3(%arg0: i32, %arg1: i32) -> (i32, i32) {
    %c0_i32 = arith.constant 0 : i32
    %c0_i32_0 = arith.constant 0 : i32
    return %c0_i32, %arg1 : i32, i32
  }
  func.func @transform_4(%arg0: i32, %arg1: i32) -> (i32, i32) {
    %c0_i32 = arith.constant 0 : i32
    return %arg0, %arg1 : i32, i32
  }
}

module attributes {stable_mosaic.version = 11 : i64} {
  func.func @kernel(%arg0: i32, %arg1: i32, %arg2: memref<1x8x32xf32, #tpu.memory_space<vmem>>, %arg3: memref<1x8x64xf32, #tpu.memory_space<vmem>>, %arg4: memref<1x8x32xf32, #tpu.memory_space<vmem>>) attributes {dimension_semantics = [#tpu.dimension_semantics<parallel>, #tpu.dimension_semantics<parallel>], iteration_bounds = array<i64: 2, 1>, scalar_prefetch = 0 : i64, scratch_operands = 0 : i64, tpu.core_type = #tpu.core_type<tc>, window_params = [{transform_indices = @transform_0, window_bounds = array<i64: 1, 8, 32>}, {transform_indices = @transform_1, window_bounds = array<i64: 1, 8, 64>}, {transform_indices = @transform_2, window_bounds = array<i64: 1, 8, 32>}]} {
    %c0 = arith.constant 0 : index
    %c0_0 = arith.constant 0 : index
    %c0_1 = arith.constant 0 : index
    %0 = vector.load %arg2[%c0, %c0_0, %c0_1] : memref<1x8x32xf32, #tpu.memory_space<vmem>>, vector<1x8x32xf32>
    %1 = vector.shape_cast %0 : vector<1x8x32xf32> to vector<8x32xf32>
    %c0_2 = arith.constant 0 : index
    %c0_3 = arith.constant 0 : index
    %c0_4 = arith.constant 0 : index
    %2 = vector.load %arg3[%c0_2, %c0_3, %c0_4] : memref<1x8x64xf32, #tpu.memory_space<vmem>>, vector<1x8x64xf32>
    %3 = vector.shape_cast %2 : vector<1x8x64xf32> to vector<8x64xf32>
    %c8_i32 = arith.constant 8 : i32
    %4 = arith.muli %arg1, %c8_i32 : i32
    %5 = tpu.iota {dimensions = array<i32: 0>} : vector<8x8xi32>
    %6 = vector.broadcast %4 : i32 to vector<8x8xi32>
    %7 = arith.addi %6, %5 : vector<8x8xi32>
    %8 = tpu.iota {dimensions = array<i32: 1>} : vector<8x8xi32>
    %9 = arith.cmpi sge, %7, %8 : vector<8x8xi32>
    %cst = arith.constant 0.000000e+00 : f32
    %cst_5 = arith.constant -1.000000e+09 : f32
    %10 = vector.broadcast %cst : f32 to vector<8x8xf32>
    %11 = vector.broadcast %cst_5 : f32 to vector<8x8xf32>
    %12 = arith.select %9, %10, %11 : vector<8x8xi1>, vector<8x8xf32>
    %13 = vector.extract_strided_slice %1 {offsets = [0, 0], sizes = [8, 8], strides = [1, 1]} : vector<8x32xf32> to vector<8x8xf32>
    %14 = vector.extract_strided_slice %3 {offsets = [0, 0], sizes = [8, 8], strides = [1, 1]} : vector<8x64xf32> to vector<8x8xf32>
    %15 = vector.extract_strided_slice %3 {offsets = [0, 32], sizes = [8, 8], strides = [1, 1]} : vector<8x64xf32> to vector<8x8xf32>
    %16 = arith.truncf %13 : vector<8x8xf32> to vector<8x8xbf16>
    %17 = arith.truncf %14 : vector<8x8xf32> to vector<8x8xbf16>
    %cst_6 = arith.constant dense<0.000000e+00> : vector<8x8xf32>
    %18 = tpu.matmul %16, %17, %cst_6 {dimension_numbers = #tpu.dot_dimension_numbers<[1], [1], [0], [0], [0, 0, 1, 0], [], []>} : vector<8x8xbf16>, vector<8x8xbf16>, vector<8x8xf32> -> vector<8x8xf32>
    %cst_7 = arith.constant 0.353553385 : f32
    %19 = vector.broadcast %cst_7 : f32 to vector<8x8xf32>
    %20 = arith.mulf %18, %19 : vector<8x8xf32>
    %21 = arith.addf %20, %12 : vector<8x8xf32>
    %cst_8 = arith.constant dense<0xFF800000> : vector<8xf32>
    %22 = vector.multi_reduction <maximumf>, %21, %cst_8 [1] : vector<8x8xf32> to vector<8xf32>
    %23 = vector.shape_cast %22 : vector<8xf32> to vector<8x1xf32>
    %24 = vector.broadcast %23 : vector<8x1xf32> to vector<8x8xf32>
    %25 = arith.subf %21, %24 : vector<8x8xf32>
    %26 = math.exp %25 : vector<8x8xf32>
    %cst_9 = arith.constant dense<0.000000e+00> : vector<8xf32>
    %27 = vector.multi_reduction <add>, %26, %cst_9 [1] : vector<8x8xf32> to vector<8xf32>
    %28 = vector.shape_cast %27 : vector<8xf32> to vector<8x1xf32>
    %29 = tpu.reciprocal %28 {approx = true} : vector<8x1xf32> -> vector<8x1xf32>
    %30 = vector.broadcast %29 : vector<8x1xf32> to vector<8x8xf32>
    %31 = arith.mulf %26, %30 : vector<8x8xf32>
    %32 = arith.truncf %31 : vector<8x8xf32> to vector<8x8xbf16>
    %33 = arith.truncf %15 : vector<8x8xf32> to vector<8x8xbf16>
    %cst_10 = arith.constant dense<0.000000e+00> : vector<8x8xf32>
    %34 = tpu.matmul %32, %33, %cst_10 {dimension_numbers = #tpu.dot_dimension_numbers<[1], [0], [0], [1], [0, 0, 1, 1], [], []>} : vector<8x8xbf16>, vector<8x8xbf16>, vector<8x8xf32> -> vector<8x8xf32>
    %c0_11 = arith.constant 0 : index
    %c0_12 = arith.constant 0 : index
    %c0_13 = arith.constant 0 : index
    %35 = vector.load %arg4[%c0_11, %c0_12, %c0_13] : memref<1x8x32xf32, #tpu.memory_space<vmem>>, vector<1x8x8xf32>
    %36 = vector.shape_cast %35 : vector<1x8x8xf32> to vector<8x8xf32>
    %37 = vector.shape_cast %34 : vector<8x8xf32> to vector<1x8x8xf32>
    tpu.vector_store %arg4[%c0_11, %c0_12, %c0_13], %37 {strides = array<i32>} : memref<1x8x32xf32, #tpu.memory_space<vmem>>, vector<1x8x8xf32>,
    %38 = vector.extract_strided_slice %1 {offsets = [0, 8], sizes = [8, 8], strides = [1, 1]} : vector<8x32xf32> to vector<8x8xf32>
    %39 = vector.extract_strided_slice %3 {offsets = [0, 8], sizes = [8, 8], strides = [1, 1]} : vector<8x64xf32> to vector<8x8xf32>
    %40 = vector.extract_strided_slice %3 {offsets = [0, 40], sizes = [8, 8], strides = [1, 1]} : vector<8x64xf32> to vector<8x8xf32>
    %41 = arith.truncf %38 : vector<8x8xf32> to vector<8x8xbf16>
    %42 = arith.truncf %39 : vector<8x8xf32> to vector<8x8xbf16>
    %cst_14 = arith.constant dense<0.000000e+00> : vector<8x8xf32>
    %43 = tpu.matmul %41, %42, %cst_14 {dimension_numbers = #tpu.dot_dimension_numbers<[1], [1], [0], [0], [0, 0, 1, 0], [], []>} : vector<8x8xbf16>, vector<8x8xbf16>, vector<8x8xf32> -> vector<8x8xf32>
    %cst_15 = arith.constant 0.353553385 : f32
    %44 = vector.broadcast %cst_15 : f32 to vector<8x8xf32>
    %45 = arith.mulf %43, %44 : vector<8x8xf32>
    %46 = arith.addf %45, %12 : vector<8x8xf32>
    %cst_16 = arith.constant dense<0xFF800000> : vector<8xf32>
    %47 = vector.multi_reduction <maximumf>, %46, %cst_16 [1] : vector<8x8xf32> to vector<8xf32>
    %48 = vector.shape_cast %47 : vector<8xf32> to vector<8x1xf32>
    %49 = vector.broadcast %48 : vector<8x1xf32> to vector<8x8xf32>
    %50 = arith.subf %46, %49 : vector<8x8xf32>
    %51 = math.exp %50 : vector<8x8xf32>
    %cst_17 = arith.constant dense<0.000000e+00> : vector<8xf32>
    %52 = vector.multi_reduction <add>, %51, %cst_17 [1] : vector<8x8xf32> to vector<8xf32>
    %53 = vector.shape_cast %52 : vector<8xf32> to vector<8x1xf32>
    %54 = tpu.reciprocal %53 {approx = true} : vector<8x1xf32> -> vector<8x1xf32>
    %55 = vector.broadcast %54 : vector<8x1xf32> to vector<8x8xf32>
    %56 = arith.mulf %51, %55 : vector<8x8xf32>
    %57 = arith.truncf %56 : vector<8x8xf32> to vector<8x8xbf16>
    %58 = arith.truncf %40 : vector<8x8xf32> to vector<8x8xbf16>
    %cst_18 = arith.constant dense<0.000000e+00> : vector<8x8xf32>
    %59 = tpu.matmul %57, %58, %cst_18 {dimension_numbers = #tpu.dot_dimension_numbers<[1], [0], [0], [1], [0, 0, 1, 1], [], []>} : vector<8x8xbf16>, vector<8x8xbf16>, vector<8x8xf32> -> vector<8x8xf32>
    %c0_19 = arith.constant 0 : index
    %c0_20 = arith.constant 0 : index
    %c8 = arith.constant 8 : index
    %60 = vector.load %arg4[%c0_19, %c0_20, %c8] : memref<1x8x32xf32, #tpu.memory_space<vmem>>, vector<1x8x8xf32>
    %61 = vector.shape_cast %60 : vector<1x8x8xf32> to vector<8x8xf32>
    %62 = vector.shape_cast %59 : vector<8x8xf32> to vector<1x8x8xf32>
    tpu.vector_store %arg4[%c0_19, %c0_20, %c8], %62 {strides = array<i32>} : memref<1x8x32xf32, #tpu.memory_space<vmem>>, vector<1x8x8xf32>,
    %63 = vector.extract_strided_slice %1 {offsets = [0, 16], sizes = [8, 8], strides = [1, 1]} : vector<8x32xf32> to vector<8x8xf32>
    %64 = vector.extract_strided_slice %3 {offsets = [0, 16], sizes = [8, 8], strides = [1, 1]} : vector<8x64xf32> to vector<8x8xf32>
    %65 = vector.extract_strided_slice %3 {offsets = [0, 48], sizes = [8, 8], strides = [1, 1]} : vector<8x64xf32> to vector<8x8xf32>
    %66 = arith.truncf %63 : vector<8x8xf32> to vector<8x8xbf16>
    %67 = arith.truncf %64 : vector<8x8xf32> to vector<8x8xbf16>
    %cst_21 = arith.constant dense<0.000000e+00> : vector<8x8xf32>
    %68 = tpu.matmul %66, %67, %cst_21 {dimension_numbers = #tpu.dot_dimension_numbers<[1], [1], [0], [0], [0, 0, 1, 0], [], []>} : vector<8x8xbf16>, vector<8x8xbf16>, vector<8x8xf32> -> vector<8x8xf32>
    %cst_22 = arith.constant 0.353553385 : f32
    %69 = vector.broadcast %cst_22 : f32 to vector<8x8xf32>
    %70 = arith.mulf %68, %69 : vector<8x8xf32>
    %71 = arith.addf %70, %12 : vector<8x8xf32>
    %cst_23 = arith.constant dense<0xFF800000> : vector<8xf32>
    %72 = vector.multi_reduction <maximumf>, %71, %cst_23 [1] : vector<8x8xf32> to vector<8xf32>
    %73 = vector.shape_cast %72 : vector<8xf32> to vector<8x1xf32>
    %74 = vector.broadcast %73 : vector<8x1xf32> to vector<8x8xf32>
    %75 = arith.subf %71, %74 : vector<8x8xf32>
    %76 = math.exp %75 : vector<8x8xf32>
    %cst_24 = arith.constant dense<0.000000e+00> : vector<8xf32>
    %77 = vector.multi_reduction <add>, %76, %cst_24 [1] : vector<8x8xf32> to vector<8xf32>
    %78 = vector.shape_cast %77 : vector<8xf32> to vector<8x1xf32>
    %79 = tpu.reciprocal %78 {approx = true} : vector<8x1xf32> -> vector<8x1xf32>
    %80 = vector.broadcast %79 : vector<8x1xf32> to vector<8x8xf32>
    %81 = arith.mulf %76, %80 : vector<8x8xf32>
    %82 = arith.truncf %81 : vector<8x8xf32> to vector<8x8xbf16>
    %83 = arith.truncf %65 : vector<8x8xf32> to vector<8x8xbf16>
    %cst_25 = arith.constant dense<0.000000e+00> : vector<8x8xf32>
    %84 = tpu.matmul %82, %83, %cst_25 {dimension_numbers = #tpu.dot_dimension_numbers<[1], [0], [0], [1], [0, 0, 1, 1], [], []>} : vector<8x8xbf16>, vector<8x8xbf16>, vector<8x8xf32> -> vector<8x8xf32>
    %c0_26 = arith.constant 0 : index
    %c0_27 = arith.constant 0 : index
    %c16 = arith.constant 16 : index
    %85 = vector.load %arg4[%c0_26, %c0_27, %c16] : memref<1x8x32xf32, #tpu.memory_space<vmem>>, vector<1x8x8xf32>
    %86 = vector.shape_cast %85 : vector<1x8x8xf32> to vector<8x8xf32>
    %87 = vector.shape_cast %84 : vector<8x8xf32> to vector<1x8x8xf32>
    tpu.vector_store %arg4[%c0_26, %c0_27, %c16], %87 {strides = array<i32>} : memref<1x8x32xf32, #tpu.memory_space<vmem>>, vector<1x8x8xf32>,
    %88 = vector.extract_strided_slice %1 {offsets = [0, 24], sizes = [8, 8], strides = [1, 1]} : vector<8x32xf32> to vector<8x8xf32>
    %89 = vector.extract_strided_slice %3 {offsets = [0, 24], sizes = [8, 8], strides = [1, 1]} : vector<8x64xf32> to vector<8x8xf32>
    %90 = vector.extract_strided_slice %3 {offsets = [0, 56], sizes = [8, 8], strides = [1, 1]} : vector<8x64xf32> to vector<8x8xf32>
    %91 = arith.truncf %88 : vector<8x8xf32> to vector<8x8xbf16>
    %92 = arith.truncf %89 : vector<8x8xf32> to vector<8x8xbf16>
    %cst_28 = arith.constant dense<0.000000e+00> : vector<8x8xf32>
    %93 = tpu.matmul %91, %92, %cst_28 {dimension_numbers = #tpu.dot_dimension_numbers<[1], [1], [0], [0], [0, 0, 1, 0], [], []>} : vector<8x8xbf16>, vector<8x8xbf16>, vector<8x8xf32> -> vector<8x8xf32>
    %cst_29 = arith.constant 0.353553385 : f32
    %94 = vector.broadcast %cst_29 : f32 to vector<8x8xf32>
    %95 = arith.mulf %93, %94 : vector<8x8xf32>
    %96 = arith.addf %95, %12 : vector<8x8xf32>
    %cst_30 = arith.constant dense<0xFF800000> : vector<8xf32>
    %97 = vector.multi_reduction <maximumf>, %96, %cst_30 [1] : vector<8x8xf32> to vector<8xf32>
    %98 = vector.shape_cast %97 : vector<8xf32> to vector<8x1xf32>
    %99 = vector.broadcast %98 : vector<8x1xf32> to vector<8x8xf32>
    %100 = arith.subf %96, %99 : vector<8x8xf32>
    %101 = math.exp %100 : vector<8x8xf32>
    %cst_31 = arith.constant dense<0.000000e+00> : vector<8xf32>
    %102 = vector.multi_reduction <add>, %101, %cst_31 [1] : vector<8x8xf32> to vector<8xf32>
    %103 = vector.shape_cast %102 : vector<8xf32> to vector<8x1xf32>
    %104 = tpu.reciprocal %103 {approx = true} : vector<8x1xf32> -> vector<8x1xf32>
    %105 = vector.broadcast %104 : vector<8x1xf32> to vector<8x8xf32>
    %106 = arith.mulf %101, %105 : vector<8x8xf32>
    %107 = arith.truncf %106 : vector<8x8xf32> to vector<8x8xbf16>
    %108 = arith.truncf %90 : vector<8x8xf32> to vector<8x8xbf16>
    %cst_32 = arith.constant dense<0.000000e+00> : vector<8x8xf32>
    %109 = tpu.matmul %107, %108, %cst_32 {dimension_numbers = #tpu.dot_dimension_numbers<[1], [0], [0], [1], [0, 0, 1, 1], [], []>} : vector<8x8xbf16>, vector<8x8xbf16>, vector<8x8xf32> -> vector<8x8xf32>
    %c0_33 = arith.constant 0 : index
    %c0_34 = arith.constant 0 : index
    %c24 = arith.constant 24 : index
    %110 = vector.load %arg4[%c0_33, %c0_34, %c24] : memref<1x8x32xf32, #tpu.memory_space<vmem>>, vector<1x8x8xf32>
    %111 = vector.shape_cast %110 : vector<1x8x8xf32> to vector<8x8xf32>
    %112 = vector.shape_cast %109 : vector<8x8xf32> to vector<1x8x8xf32>
    tpu.vector_store %arg4[%c0_33, %c0_34, %c24], %112 {strides = array<i32>} : memref<1x8x32xf32, #tpu.memory_space<vmem>>, vector<1x8x8xf32>,
    return
  }
  func.func @transform_0(%arg0: i32, %arg1: i32) -> (i32, i32, i32) {
    %c0_i32 = arith.constant 0 : i32
    %c0_i32_0 = arith.constant 0 : i32
    return %arg0, %arg1, %c0_i32 : i32, i32, i32
  }
  func.func @transform_1(%arg0: i32, %arg1: i32) -> (i32, i32, i32) {
    %c0_i32 = arith.constant 0 : i32
    %c0_i32_0 = arith.constant 0 : i32
    %c0_i32_1 = arith.constant 0 : i32
    return %arg0, %c0_i32, %c0_i32_0 : i32, i32, i32
  }
  func.func @transform_2(%arg0: i32, %arg1: i32) -> (i32, i32, i32) {
    %c0_i32 = arith.constant 0 : i32
    %c0_i32_0 = arith.constant 0 : i32
    return %arg0, %arg1, %c0_i32 : i32, i32, i32
  }
}

module attributes {stable_mosaic.version = 11 : i64} {
  func.func @kernel(%arg0: i32, %arg1: i32, %arg2: memref<16x32xf32, #tpu.memory_space<vmem>>, %arg3: memref<1x32xf32, #tpu.memory_space<vmem>>, %arg4: memref<1x32xf32, #tpu.memory_space<vmem>>, %arg5: memref<32x32xbf16, #tpu.memory_space<vmem>>, %arg6: memref<16x32xf32, #tpu.memory_space<vmem>>, %arg7: memref<16x32xf32, #tpu.memory_space<vmem>>) attributes {dimension_semantics = [#tpu.dimension_semantics<parallel>, #tpu.dimension_semantics<arbitrary>], iteration_bounds = array<i64: 1, 1>, scalar_prefetch = 0 : i64, scratch_operands = 1 : i64, tpu.core_type = #tpu.core_type<tc>, window_params = [{transform_indices = @transform_0, window_bounds = array<i64: 16, 32>}, {pipeline_mode = #tpu.pipeline_mode<synchronous>, transform_indices = @transform_1, window_bounds = array<i64: 1, 32>}, {pipeline_mode = #tpu.pipeline_mode<synchronous>, transform_indices = @transform_2, window_bounds = array<i64: 1, 32>}, {transform_indices = @transform_3, window_bounds = array<i64: 32, 32>}, {transform_indices = @transform_4, window_bounds = array<i64: 16, 32>}]} {
    %c0_i32 = arith.constant 0 : i32
    %0 = arith.cmpi eq, %arg1, %c0_i32 : i32
    %1 = arith.extui %0 : i1 to i32
    %c0_i32_0 = arith.constant 0 : i32
    %2 = arith.cmpi ne, %1, %c0_i32_0 : i32
    scf.if %2 {
      %c0_6 = arith.constant 0 : index
      %c0_7 = arith.constant 0 : index
      %8 = vector.load %arg2[%c0_6, %c0_7] : memref<16x32xf32, #tpu.memory_space<vmem>>, vector<16x32xf32>
      %cst_8 = arith.constant dense<0.000000e+00> : vector<16xf32>
      %9 = vector.multi_reduction <add>, %8, %cst_8 [1] : vector<16x32xf32> to vector<16xf32>
      %10 = vector.shape_cast %9 : vector<16xf32> to vector<16x1xf32>
      %cst_9 = arith.constant 3.200000e+01 : f32
      %11 = vector.broadcast %cst_9 : f32 to vector<16x1xf32>
      %12 = arith.divf %10, %11 : vector<16x1xf32>
      %13 = vector.broadcast %12 : vector<16x1xf32> to vector<16x32xf32>
      %14 = arith.subf %8, %13 : vector<16x32xf32>
      %15 = arith.mulf %14, %14 : vector<16x32xf32>
      %cst_10 = arith.constant dense<0.000000e+00> : vector<16xf32>
      %16 = vector.multi_reduction <add>, %15, %cst_10 [1] : vector<16x32xf32> to vector<16xf32>
      %17 = vector.shape_cast %16 : vector<16xf32> to vector<16x1xf32>
      %cst_11 = arith.constant 3.100000e+01 : f32
      %18 = vector.broadcast %cst_11 : f32 to vector<16x1xf32>
      %19 = arith.divf %17, %18 : vector<16x1xf32>
      %20 = math.sqrt %19 : vector<16x1xf32>
      %cst_12 = arith.constant 9.99999997E-7 : f32
      %21 = vector.broadcast %cst_12 : f32 to vector<16x1xf32>
      %22 = arith.addf %20, %21 : vector<16x1xf32>
      %23 = tpu.reciprocal %22 {approx = true} : vector<16x1xf32> -> vector<16x1xf32>
      %c0_13 = arith.constant 0 : index
      %c0_14 = arith.constant 0 : index
      %24 = vector.load %arg3[%c0_13, %c0_14] : memref<1x32xf32, #tpu.memory_space<vmem>>, vector<1x32xf32>
      %25 = vector.broadcast %12 : vector<16x1xf32> to vector<16x32xf32>
      %26 = arith.subf %8, %25 : vector<16x32xf32>
      %27 = vector.broadcast %24 : vector<1x32xf32> to vector<16x32xf32>
      %28 = arith.mulf %27, %26 : vector<16x32xf32>
      %29 = vector.broadcast %23 : vector<16x1xf32> to vector<16x32xf32>
      %30 = arith.mulf %28, %29 : vector<16x32xf32>
      %c0_15 = arith.constant 0 : index
      %c0_16 = arith.constant 0 : index
      %31 = vector.load %arg4[%c0_15, %c0_16] : memref<1x32xf32, #tpu.memory_space<vmem>>, vector<1x32xf32>
      %32 = vector.broadcast %31 : vector<1x32xf32> to vector<16x32xf32>
      %33 = arith.addf %30, %32 : vector<16x32xf32>
      %c0_17 = arith.constant 0 : index
      %c0_18 = arith.constant 0 : index
      %34 = vector.load %arg7[%c0_17, %c0_18] : memref<16x32xf32, #tpu.memory_space<vmem>>, vector<16x32xf32>
      tpu.vector_store %arg7[%c0_17, %c0_18], %33 {strides = array<i32>} : memref<16x32xf32, #tpu.memory_space<vmem>>, vector<16x32xf32>,
    } else {
    }
    %c0 = arith.constant 0 : index
    %c0_1 = arith.constant 0 : index
    %3 = vector.load %arg7[%c0, %c0_1] : memref<16x32xf32, #tpu.memory_space<vmem>>, vector<16x32xf32>
    %4 = arith.truncf %3 : vector<16x32xf32> to vector<16x32xbf16>
    %c0_2 = arith.constant 0 : index
    %c0_3 = arith.constant 0 : index
    %5 = vector.load %arg5[%c0_2, %c0_3] : memref<32x32xbf16, #tpu.memory_space<vmem>>, vector<32x32xbf16>
    %cst = arith.constant dense<0.000000e+00> : vector<16x32xf32>
    %6 = tpu.matmul %4, %5, %cst {dimension_numbers = #tpu.dot_dimension_numbers<[1], [0], [0], [1], [0, 0, 1, 1], [], []>} : vector<16x32xbf16>, vector<32x32xbf16>, vector<16x32xf32> -> vector<16x32xf32>
    %c0_4 = arith.constant 0 : index
    %c0_5 = arith.constant 0 : index
    %7 = vector.load %arg6[%c0_4, %c0_5] : memref<16x32xf32, #tpu.memory_space<vmem>>, vector<16x32xf32>
    tpu.vector_store %arg6[%c0_4, %c0_5], %6 {strides = array<i32>} : memref<16x32xf32, #tpu.memory_space<vmem>>, vector<16x32xf32>,
    return
  }
  func.func @transform_0(%arg0: i32, %arg1: i32) -> (i32, i32) {
    %c0_i32 = arith.constant 0 : i32
    %c0_i32_0 = arith.constant 0 : i32
    return %arg0, %c0_i32 : i32, i32
  }
  func.func @transform_1(%arg0: i32, %arg1: i32) -> (i32, i32) {
    %c0_i32 = arith.constant 0 : i32
    %c0_i32_0 = arith.constant 0 : i32
    %c0_i32_1 = arith.constant 0 : i32
    return %c0_i32, %c0_i32_0 : i32, i32
  }
  func.func @transform_2(%arg0: i32, %arg1: i32) -> (i32, i32) {
    %c0_i32 = arith.constant 0 : i32
    %c0_i32_0 = arith.constant 0 : i32
    %c0_i32_1 = arith.constant 0 : i32
    return %c0_i32, %c0_i32_0 : i32, i32
  }
  func.func @transform_3(%arg0: i32, %arg1: i32) -> (i32, i32) {
    %c0_i32 = arith.constant 0 : i32
    %c0_i32_0 = arith.constant 0 : i32
    return %c0_i32, %arg1 : i32, i32
  }
  func.func @transform_4(%arg0: i32, %arg1: i32) -> (i32, i32) {
    %c0_i32 = arith.constant 0 : i32
    return %arg0, %arg1 : i32, i32
  }
}

module attributes {stable_mosaic.version = 11 : i64} {
  func.func @kernel(%arg0: i32, %arg1: i32, %arg2: memref<16x32xf32, #tpu.memory_space<vmem>>, %arg3: memref<32x64xbf16, #tpu.memory_space<vmem>>, %arg4: memref<16x64xf32, #tpu.memory_space<vmem>>) attributes {dimension_semantics = [#tpu.dimension_semantics<parallel>, #tpu.dimension_semantics<parallel>], iteration_bounds = array<i64: 1, 1>, scalar_prefetch = 0 : i64, scratch_operands = 0 : i64, tpu.core_type = #tpu.core_type<tc>, window_params = [{transform_indices = @transform_0, window_bounds = array<i64: 16, 32>}, {transform_indices = @transform_1, window_bounds = array<i64: 32, 64>}, {transform_indices = @transform_2, window_bounds = array<i64: 16, 64>}]} {
    %c0 = arith.constant 0 : index
    %c0_0 = arith.constant 0 : index
    %0 = vector.load %arg2[%c0, %c0_0] : memref<16x32xf32, #tpu.memory_space<vmem>>, vector<16x32xf32>
    %1 = arith.truncf %0 : vector<16x32xf32> to vector<16x32xbf16>
    %c0_1 = arith.constant 0 : index
    %c0_2 = arith.constant 0 : index
    %2 = vector.load %arg3[%c0_1, %c0_2] : memref<32x64xbf16, #tpu.memory_space<vmem>>, vector<32x64xbf16>
    %cst = arith.constant dense<0.000000e+00> : vector<16x64xf32>
    %3 = tpu.matmul %1, %2, %cst {dimension_numbers = #tpu.dot_dimension_numbers<[1], [0], [0], [1], [0, 0, 1, 1], [], []>} : vector<16x32xbf16>, vector<32x64xbf16>, vector<16x64xf32> -> vector<16x64xf32>
    %c0_3 = arith.constant 0 : index
    %c0_4 = arith.constant 0 : index
    %4 = vector.load %arg4[%c0_3, %c0_4] : memref<16x64xf32, #tpu.memory_space<vmem>>, vector<16x64xf32>
    tpu.vector_store %arg4[%c0_3, %c0_4], %3 {strides = array<i32>} : memref<16x64xf32, #tpu.memory_space<vmem>>, vector<16x64xf32>,
    return
  }
  func.func @transform_0(%arg0: i32, %arg1: i32) -> (i32, i32) {
    %c0_i32 = arith.constant 0 : i32
    %c0_i32_0 = arith.constant 0 : i32
    return %arg0, %c0_i32 : i32, i32
  }
  func.func @transform_1(%arg0: i32, %arg1: i32) -> (i32, i32) {
    %c0_i32 = arith.constant 0 : i32
    %c0_i32_0 = arith.constant 0 : i32
    return %c0_i32, %arg1 : i32, i32
  }
  func.func @transform_2(%arg0: i32, %arg1: i32) -> (i32, i32) {
    %c0_i32 = arith.constant 0 : i32
    return %arg0, %arg1 : i32, i32
  }
}

module attributes {stable_mosaic.version = 11 : i64} {
  func.func @kernel(%arg0: i32, %arg1: i32, %arg2: memref<1x8x32xf32, #tpu.memory_space<vmem>>, %arg3: memref<1x8x64xf32, #tpu.memory_space<vmem>>, %arg4: memref<1x1x1x8xf32, #tpu.memory_space<vmem>>, %arg5: memref<1x8x32xf32, #tpu.memory_space<vmem>>) attributes {dimension_semantics = [#tpu.dimension_semantics<parallel>, #tpu.dimension_semantics<parallel>], iteration_bounds = array<i64: 2, 1>, scalar_prefetch = 0 : i64, scratch_operands = 0 : i64, tpu.core_type = #tpu.core_type<tc>, window_params = [{transform_indices = @transform_0, window_bounds = array<i64: 1, 8, 32>}, {transform_indices = @transform_1, window_bounds = array<i64: 1, 8, 64>}, {transform_indices = @transform_2, window_bounds = array<i64: 1, 1, 1, 8>}, {transform_indices = @transform_3, window_bounds = array<i64: 1, 8, 32>}]} {
    %c0 = arith.constant 0 : index
    %c0_0 = arith.constant 0 : index
    %c0_1 = arith.constant 0 : index
    %0 = vector.load %arg2[%c0, %c0_0, %c0_1] : memref<1x8x32xf32, #tpu.memory_space<vmem>>, vector<1x8x32xf32>
    %1 = vector.shape_cast %0 : vector<1x8x32xf32> to vector<8x32xf32>
    %c0_2 = arith.constant 0 : index
    %c0_3 = arith.constant 0 : index
    %c0_4 = arith.constant 0 : index
    %2 = vector.load %arg3[%c0_2, %c0_3, %c0_4] : memref<1x8x64xf32, #tpu.memory_space<vmem>>, vector<1x8x64xf32>
    %3 = vector.shape_cast %2 : vector<1x8x64xf32> to vector<8x64xf32>
    %c0_5 = arith.constant 0 : index
    %c0_6 = arith.constant 0 : index
    %c0_7 = arith.constant 0 : index
    %c0_8 = arith.constant 0 : index
    %4 = vector.load %arg4[%c0_5, %c0_6, %c0_7, %c0_8] : memref<1x1x1x8xf32, #tpu.memory_space<vmem>>, vector<1x1x1x8xf32>
    %5 = vector.shape_cast %4 : vector<1x1x1x8xf32> to vector<1x8xf32>
    %cst = arith.constant 0.000000e+00 : f32
    %6 = vector.broadcast %cst : f32 to vector<1x8xf32>
    %7 = arith.cmpf oeq, %5, %6 : vector<1x8xf32>
    %cst_9 = arith.constant -1.000000e+09 : f32
    %cst_10 = arith.constant 0.000000e+00 : f32
    %8 = vector.broadcast %cst_9 : f32 to vector<1x8xf32>
    %9 = vector.broadcast %cst_10 : f32 to vector<1x8xf32>
    %10 = arith.select %7, %8, %9 : vector<1x8xi1>, vector<1x8xf32>
    %11 = vector.extract_strided_slice %1 {offsets = [0, 0], sizes = [8, 8], strides = [1, 1]} : vector<8x32xf32> to vector<8x8xf32>
    %12 = vector.extract_strided_slice %3 {offsets = [0, 0], sizes = [8, 8], strides = [1, 1]} : vector<8x64xf32> to vector<8x8xf32>
    %13 = vector.extract_strided_slice %3 {offsets = [0, 32], sizes = [8, 8], strides = [1, 1]} : vector<8x64xf32> to vector<8x8xf32>
    %14 = arith.truncf %11 : vector<8x8xf32> to vector<8x8xbf16>
    %15 = arith.truncf %12 : vector<8x8xf32> to vector<8x8xbf16>
    %cst_11 = arith.constant dense<0.000000e+00> : vector<8x8xf32>
    %16 = tpu.matmul %14, %15, %cst_11 {dimension_numbers = #tpu.dot_dimension_numbers<[1], [1], [0], [0], [0, 0, 1, 0], [], []>} : vector<8x8xbf16>, vector<8x8xbf16>, vector<8x8xf32> -> vector<8x8xf32>
    %cst_12 = arith.constant 0.353553385 : f32
    %17 = vector.broadcast %cst_12 : f32 to vector<8x8xf32>
    %18 = arith.mulf %16, %17 : vector<8x8xf32>
    %19 = vector.broadcast %10 : vector<1x8xf32> to vector<8x8xf32>
    %20 = arith.addf %18, %19 : vector<8x8xf32>
    %cst_13 = arith.constant dense<0xFF800000> : vector<8xf32>
    %21 = vector.multi_reduction <maximumf>, %20, %cst_13 [1] : vector<8x8xf32> to vector<8xf32>
    %22 = vector.shape_cast %21 : vector<8xf32> to vector<8x1xf32>
    %23 = vector.broadcast %22 : vector<8x1xf32> to vector<8x8xf32>
    %24 = arith.subf %20, %23 : vector<8x8xf32>
    %25 = math.exp %24 : vector<8x8xf32>
    %cst_14 = arith.constant dense<0.000000e+00> : vector<8xf32>
    %26 = vector.multi_reduction <add>, %25, %cst_14 [1] : vector<8x8xf32> to vector<8xf32>
    %27 = vector.shape_cast %26 : vector<8xf32> to vector<8x1xf32>
    %28 = tpu.reciprocal %27 {approx = true} : vector<8x1xf32> -> vector<8x1xf32>
    %29 = vector.broadcast %28 : vector<8x1xf32> to vector<8x8xf32>
    %30 = arith.mulf %25, %29 : vector<8x8xf32>
    %31 = arith.truncf %30 : vector<8x8xf32> to vector<8x8xbf16>
    %32 = arith.truncf %13 : vector<8x8xf32> to vector<8x8xbf16>
    %cst_15 = arith.constant dense<0.000000e+00> : vector<8x8xf32>
    %33 = tpu.matmul %31, %32, %cst_15 {dimension_numbers = #tpu.dot_dimension_numbers<[1], [0], [0], [1], [0, 0, 1, 1], [], []>} : vector<8x8xbf16>, vector<8x8xbf16>, vector<8x8xf32> -> vector<8x8xf32>
    %c0_16 = arith.constant 0 : index
    %c0_17 = arith.constant 0 : index
    %c0_18 = arith.constant 0 : index
    %34 = vector.load %arg5[%c0_16, %c0_17, %c0_18] : memref<1x8x32xf32, #tpu.memory_space<vmem>>, vector<1x8x8xf32>
    %35 = vector.shape_cast %34 : vector<1x8x8xf32> to vector<8x8xf32>
    %36 = vector.shape_cast %33 : vector<8x8xf32> to vector<1x8x8xf32>
    tpu.vector_store %arg5[%c0_16, %c0_17, %c0_18], %36 {strides = array<i32>} : memref<1x8x32xf32, #tpu.memory_space<vmem>>, vector<1x8x8xf32>,
    %37 = vector.extract_strided_slice %1 {offsets = [0, 8], sizes = [8, 8], strides = [1, 1]} : vector<8x32xf32> to vector<8x8xf32>
    %38 = vector.extract_strided_slice %3 {offsets = [0, 8], sizes = [8, 8], strides = [1, 1]} : vector<8x64xf32> to vector<8x8xf32>
    %39 = vector.extract_strided_slice %3 {offsets = [0, 40], sizes = [8, 8], strides = [1, 1]} : vector<8x64xf32> to vector<8x8xf32>
    %40 = arith.truncf %37 : vector<8x8xf32> to vector<8x8xbf16>
    %41 = arith.truncf %38 : vector<8x8xf32> to vector<8x8xbf16>
    %cst_19 = arith.constant dense<0.000000e+00> : vector<8x8xf32>
    %42 = tpu.matmul %40, %41, %cst_19 {dimension_numbers = #tpu.dot_dimension_numbers<[1], [1], [0], [0], [0, 0, 1, 0], [], []>} : vector<8x8xbf16>, vector<8x8xbf16>, vector<8x8xf32> -> vector<8x8xf32>
    %cst_20 = arith.constant 0.353553385 : f32
    %43 = vector.broadcast %cst_20 : f32 to vector<8x8xf32>
    %44 = arith.mulf %42, %43 : vector<8x8xf32>
    %45 = vector.broadcast %10 : vector<1x8xf32> to vector<8x8xf32>
    %46 = arith.addf %44, %45 : vector<8x8xf32>
    %cst_21 = arith.constant dense<0xFF800000> : vector<8xf32>
    %47 = vector.multi_reduction <maximumf>, %46, %cst_21 [1] : vector<8x8xf32> to vector<8xf32>
    %48 = vector.shape_cast %47 : vector<8xf32> to vector<8x1xf32>
    %49 = vector.broadcast %48 : vector<8x1xf32> to vector<8x8xf32>
    %50 = arith.subf %46, %49 : vector<8x8xf32>
    %51 = math.exp %50 : vector<8x8xf32>
    %cst_22 = arith.constant dense<0.000000e+00> : vector<8xf32>
    %52 = vector.multi_reduction <add>, %51, %cst_22 [1] : vector<8x8xf32> to vector<8xf32>
    %53 = vector.shape_cast %52 : vector<8xf32> to vector<8x1xf32>
    %54 = tpu.reciprocal %53 {approx = true} : vector<8x1xf32> -> vector<8x1xf32>
    %55 = vector.broadcast %54 : vector<8x1xf32> to vector<8x8xf32>
    %56 = arith.mulf %51, %55 : vector<8x8xf32>
    %57 = arith.truncf %56 : vector<8x8xf32> to vector<8x8xbf16>
    %58 = arith.truncf %39 : vector<8x8xf32> to vector<8x8xbf16>
    %cst_23 = arith.constant dense<0.000000e+00> : vector<8x8xf32>
    %59 = tpu.matmul %57, %58, %cst_23 {dimension_numbers = #tpu.dot_dimension_numbers<[1], [0], [0], [1], [0, 0, 1, 1], [], []>} : vector<8x8xbf16>, vector<8x8xbf16>, vector<8x8xf32> -> vector<8x8xf32>
    %c0_24 = arith.constant 0 : index
    %c0_25 = arith.constant 0 : index
    %c8 = arith.constant 8 : index
    %60 = vector.load %arg5[%c0_24, %c0_25, %c8] : memref<1x8x32xf32, #tpu.memory_space<vmem>>, vector<1x8x8xf32>
    %61 = vector.shape_cast %60 : vector<1x8x8xf32> to vector<8x8xf32>
    %62 = vector.shape_cast %59 : vector<8x8xf32> to vector<1x8x8xf32>
    tpu.vector_store %arg5[%c0_24, %c0_25, %c8], %62 {strides = array<i32>} : memref<1x8x32xf32, #tpu.memory_space<vmem>>, vector<1x8x8xf32>,
    %63 = vector.extract_strided_slice %1 {offsets = [0, 16], sizes = [8, 8], strides = [1, 1]} : vector<8x32xf32> to vector<8x8xf32>
    %64 = vector.extract_strided_slice %3 {offsets = [0, 16], sizes = [8, 8], strides = [1, 1]} : vector<8x64xf32> to vector<8x8xf32>
    %65 = vector.extract_strided_slice %3 {offsets = [0, 48], sizes = [8, 8], strides = [1, 1]} : vector<8x64xf32> to vector<8x8xf32>
    %66 = arith.truncf %63 : vector<8x8xf32> to vector<8x8xbf16>
    %67 = arith.truncf %64 : vector<8x8xf32> to vector<8x8xbf16>
    %cst_26 = arith.constant dense<0.000000e+00> : vector<8x8xf32>
    %68 = tpu.matmul %66, %67, %cst_26 {dimension_numbers = #tpu.dot_dimension_numbers<[1], [1], [0], [0], [0, 0, 1, 0], [], []>} : vector<8x8xbf16>, vector<8x8xbf16>, vector<8x8xf32> -> vector<8x8xf32>
    %cst_27 = arith.constant 0.353553385 : f32
    %69 = vector.broadcast %cst_27 : f32 to vector<8x8xf32>
    %70 = arith.mulf %68, %69 : vector<8x8xf32>
    %71 = vector.broadcast %10 : vector<1x8xf32> to vector<8x8xf32>
    %72 = arith.addf %70, %71 : vector<8x8xf32>
    %cst_28 = arith.constant dense<0xFF800000> : vector<8xf32>
    %73 = vector.multi_reduction <maximumf>, %72, %cst_28 [1] : vector<8x8xf32> to vector<8xf32>
    %74 = vector.shape_cast %73 : vector<8xf32> to vector<8x1xf32>
    %75 = vector.broadcast %74 : vector<8x1xf32> to vector<8x8xf32>
    %76 = arith.subf %72, %75 : vector<8x8xf32>
    %77 = math.exp %76 : vector<8x8xf32>
    %cst_29 = arith.constant dense<0.000000e+00> : vector<8xf32>
    %78 = vector.multi_reduction <add>, %77, %cst_29 [1] : vector<8x8xf32> to vector<8xf32>
    %79 = vector.shape_cast %78 : vector<8xf32> to vector<8x1xf32>
    %80 = tpu.reciprocal %79 {approx = true} : vector<8x1xf32> -> vector<8x1xf32>
    %81 = vector.broadcast %80 : vector<8x1xf32> to vector<8x8xf32>
    %82 = arith.mulf %77, %81 : vector<8x8xf32>
    %83 = arith.truncf %82 : vector<8x8xf32> to vector<8x8xbf16>
    %84 = arith.truncf %65 : vector<8x8xf32> to vector<8x8xbf16>
    %cst_30 = arith.constant dense<0.000000e+00> : vector<8x8xf32>
    %85 = tpu.matmul %83, %84, %cst_30 {dimension_numbers = #tpu.dot_dimension_numbers<[1], [0], [0], [1], [0, 0, 1, 1], [], []>} : vector<8x8xbf16>, vector<8x8xbf16>, vector<8x8xf32> -> vector<8x8xf32>
    %c0_31 = arith.constant 0 : index
    %c0_32 = arith.constant 0 : index
    %c16 = arith.constant 16 : index
    %86 = vector.load %arg5[%c0_31, %c0_32, %c16] : memref<1x8x32xf32, #tpu.memory_space<vmem>>, vector<1x8x8xf32>
    %87 = vector.shape_cast %86 : vector<1x8x8xf32> to vector<8x8xf32>
    %88 = vector.shape_cast %85 : vector<8x8xf32> to vector<1x8x8xf32>
    tpu.vector_store %arg5[%c0_31, %c0_32, %c16], %88 {strides = array<i32>} : memref<1x8x32xf32, #tpu.memory_space<vmem>>, vector<1x8x8xf32>,
    %89 = vector.extract_strided_slice %1 {offsets = [0, 24], sizes = [8, 8], strides = [1, 1]} : vector<8x32xf32> to vector<8x8xf32>
    %90 = vector.extract_strided_slice %3 {offsets = [0, 24], sizes = [8, 8], strides = [1, 1]} : vector<8x64xf32> to vector<8x8xf32>
    %91 = vector.extract_strided_slice %3 {offsets = [0, 56], sizes = [8, 8], strides = [1, 1]} : vector<8x64xf32> to vector<8x8xf32>
    %92 = arith.truncf %89 : vector<8x8xf32> to vector<8x8xbf16>
    %93 = arith.truncf %90 : vector<8x8xf32> to vector<8x8xbf16>
    %cst_33 = arith.constant dense<0.000000e+00> : vector<8x8xf32>
    %94 = tpu.matmul %92, %93, %cst_33 {dimension_numbers = #tpu.dot_dimension_numbers<[1], [1], [0], [0], [0, 0, 1, 0], [], []>} : vector<8x8xbf16>, vector<8x8xbf16>, vector<8x8xf32> -> vector<8x8xf32>
    %cst_34 = arith.constant 0.353553385 : f32
    %95 = vector.broadcast %cst_34 : f32 to vector<8x8xf32>
    %96 = arith.mulf %94, %95 : vector<8x8xf32>
    %97 = vector.broadcast %10 : vector<1x8xf32> to vector<8x8xf32>
    %98 = arith.addf %96, %97 : vector<8x8xf32>
    %cst_35 = arith.constant dense<0xFF800000> : vector<8xf32>
    %99 = vector.multi_reduction <maximumf>, %98, %cst_35 [1] : vector<8x8xf32> to vector<8xf32>
    %100 = vector.shape_cast %99 : vector<8xf32> to vector<8x1xf32>
    %101 = vector.broadcast %100 : vector<8x1xf32> to vector<8x8xf32>
    %102 = arith.subf %98, %101 : vector<8x8xf32>
    %103 = math.exp %102 : vector<8x8xf32>
    %cst_36 = arith.constant dense<0.000000e+00> : vector<8xf32>
    %104 = vector.multi_reduction <add>, %103, %cst_36 [1] : vector<8x8xf32> to vector<8xf32>
    %105 = vector.shape_cast %104 : vector<8xf32> to vector<8x1xf32>
    %106 = tpu.reciprocal %105 {approx = true} : vector<8x1xf32> -> vector<8x1xf32>
    %107 = vector.broadcast %106 : vector<8x1xf32> to vector<8x8xf32>
    %108 = arith.mulf %103, %107 : vector<8x8xf32>
    %109 = arith.truncf %108 : vector<8x8xf32> to vector<8x8xbf16>
    %110 = arith.truncf %91 : vector<8x8xf32> to vector<8x8xbf16>
    %cst_37 = arith.constant dense<0.000000e+00> : vector<8x8xf32>
    %111 = tpu.matmul %109, %110, %cst_37 {dimension_numbers = #tpu.dot_dimension_numbers<[1], [0], [0], [1], [0, 0, 1, 1], [], []>} : vector<8x8xbf16>, vector<8x8xbf16>, vector<8x8xf32> -> vector<8x8xf32>
    %c0_38 = arith.constant 0 : index
    %c0_39 = arith.constant 0 : index
    %c24 = arith.constant 24 : index
    %112 = vector.load %arg5[%c0_38, %c0_39, %c24] : memref<1x8x32xf32, #tpu.memory_space<vmem>>, vector<1x8x8xf32>
    %113 = vector.shape_cast %112 : vector<1x8x8xf32> to vector<8x8xf32>
    %114 = vector.shape_cast %111 : vector<8x8xf32> to vector<1x8x8xf32>
    tpu.vector_store %arg5[%c0_38, %c0_39, %c24], %114 {strides = array<i32>} : memref<1x8x32xf32, #tpu.memory_space<vmem>>, vector<1x8x8xf32>,
    return
  }
  func.func @transform_0(%arg0: i32, %arg1: i32) -> (i32, i32, i32) {
    %c0_i32 = arith.constant 0 : i32
    %c0_i32_0 = arith.constant 0 : i32
    return %arg0, %arg1, %c0_i32 : i32, i32, i32
  }
  func.func @transform_1(%arg0: i32, %arg1: i32) -> (i32, i32, i32) {
    %c0_i32 = arith.constant 0 : i32
    %c0_i32_0 = arith.constant 0 : i32
    %c0_i32_1 = arith.constant 0 : i32
    return %arg0, %c0_i32, %c0_i32_0 : i32, i32, i32
  }
  func.func @transform_2(%arg0: i32, %arg1: i32) -> (i32, i32, i32, i32) {
    %c0_i32 = arith.constant 0 : i32
    %c0_i32_0 = arith.constant 0 : i32
    %c0_i32_1 = arith.constant 0 : i32
    %c0_i32_2 = arith.constant 0 : i32
    return %arg0, %c0_i32, %c0_i32_0, %c0_i32_1 : i32, i32, i32, i32
  }
  func.func @transform_3(%arg0: i32, %arg1: i32) -> (i32, i32, i32) {
    %c0_i32 = arith.constant 0 : i32
    %c0_i32_0 = arith.constant 0 : i32
    return %arg0, %arg1, %c0_i32 : i32, i32, i32
  }
}

module attributes {stable_mosaic.version = 11 : i64} {
  func.func @kernel(%arg0: i32, %arg1: i32, %arg2: memref<16x32xf32, #tpu.memory_space<vmem>>, %arg3: memref<1x32xf32, #tpu.memory_space<vmem>>, %arg4: memref<1x32xf32, #tpu.memory_space<vmem>>, %arg5: memref<32x64xbf16, #tpu.memory_space<vmem>>, %arg6: memref<1x64xf32, #tpu.memory_space<vmem>>, %arg7: memref<16x64xf32, #tpu.memory_space<vmem>>, %arg8: memref<16x32xf32, #tpu.memory_space<vmem>>) attributes {dimension_semantics = [#tpu.dimension_semantics<parallel>, #tpu.dimension_semantics<arbitrary>], iteration_bounds = array<i64: 1, 1>, scalar_prefetch = 0 : i64, scratch_operands = 1 : i64, tpu.core_type = #tpu.core_type<tc>, window_params = [{transform_indices = @transform_0, window_bounds = array<i64: 16, 32>}, {pipeline_mode = #tpu.pipeline_mode<synchronous>, transform_indices = @transform_1, window_bounds = array<i64: 1, 32>}, {pipeline_mode = #tpu.pipeline_mode<synchronous>, transform_indices = @transform_2, window_bounds = array<i64: 1, 32>}, {transform_indices = @transform_3, window_bounds = array<i64: 32, 64>}, {transform_indices = @transform_4, window_bounds = array<i64: 1, 64>}, {transform_indices = @transform_5, window_bounds = array<i64: 16, 64>}]} {
    %c0_i32 = arith.constant 0 : i32
    %0 = arith.cmpi eq, %arg1, %c0_i32 : i32
    %1 = arith.extui %0 : i1 to i32
    %c0_i32_0 = arith.constant 0 : i32
    %2 = arith.cmpi ne, %1, %c0_i32_0 : i32
    scf.if %2 {
      %c0_9 = arith.constant 0 : index
      %c0_10 = arith.constant 0 : index
      %13 = vector.load %arg2[%c0_9, %c0_10] : memref<16x32xf32, #tpu.memory_space<vmem>>, vector<16x32xf32>
      %cst_11 = arith.constant dense<0.000000e+00> : vector<16xf32>
      %14 = vector.multi_reduction <add>, %13, %cst_11 [1] : vector<16x32xf32> to vector<16xf32>
      %15 = vector.shape_cast %14 : vector<16xf32> to vector<16x1xf32>
      %cst_12 = arith.constant 3.200000e+01 : f32
      %16 = vector.broadcast %cst_12 : f32 to vector<16x1xf32>
      %17 = arith.divf %15, %16 : vector<16x1xf32>
      %18 = vector.broadcast %17 : vector<16x1xf32> to vector<16x32xf32>
      %19 = arith.subf %13, %18 : vector<16x32xf32>
      %20 = arith.mulf %19, %19 : vector<16x32xf32>
      %cst_13 = arith.constant dense<0.000000e+00> : vector<16xf32>
      %21 = vector.multi_reduction <add>, %20, %cst_13 [1] : vector<16x32xf32> to vector<16xf32>
      %22 = vector.shape_cast %21 : vector<16xf32> to vector<16x1xf32>
      %cst_14 = arith.constant 3.100000e+01 : f32
      %23 = vector.broadcast %cst_14 : f32 to vector<16x1xf32>
      %24 = arith.divf %22, %23 : vector<16x1xf32>
      %25 = math.sqrt %24 : vector<16x1xf32>
      %cst_15 = arith.constant 9.99999997E-7 : f32
      %26 = vector.broadcast %cst_15 : f32 to vector<16x1xf32>
      %27 = arith.addf %25, %26 : vector<16x1xf32>
      %28 = tpu.reciprocal %27 {approx = true} : vector<16x1xf32> -> vector<16x1xf32>
      %c0_16 = arith.constant 0 : index
      %c0_17 = arith.constant 0 : index
      %29 = vector.load %arg3[%c0_16, %c0_17] : memref<1x32xf32, #tpu.memory_space<vmem>>, vector<1x32xf32>
      %30 = vector.broadcast %17 : vector<16x1xf32> to vector<16x32xf32>
      %31 = arith.subf %13, %30 : vector<16x32xf32>
      %32 = vector.broadcast %29 : vector<1x32xf32> to vector<16x32xf32>
      %33 = arith.mulf %32, %31 : vector<16x32xf32>
      %34 = vector.broadcast %28 : vector<16x1xf32> to vector<16x32xf32>
      %35 = arith.mulf %33, %34 : vector<16x32xf32>
      %c0_18 = arith.constant 0 : index
      %c0_19 = arith.constant 0 : index
      %36 = vector.load %arg4[%c0_18, %c0_19] : memref<1x32xf32, #tpu.memory_space<vmem>>, vector<1x32xf32>
      %37 = vector.broadcast %36 : vector<1x32xf32> to vector<16x32xf32>
      %38 = arith.addf %35, %37 : vector<16x32xf32>
      %c0_20 = arith.constant 0 : index
      %c0_21 = arith.constant 0 : index
      %39 = vector.load %arg8[%c0_20, %c0_21] : memref<16x32xf32, #tpu.memory_space<vmem>>, vector<16x32xf32>
      tpu.vector_store %arg8[%c0_20, %c0_21], %38 {strides = array<i32>} : memref<16x32xf32, #tpu.memory_space<vmem>>, vector<16x32xf32>,
    } else {
    }
    %c0 = arith.constant 0 : index
    %c0_1 = arith.constant 0 : index
    %3 = vector.load %arg8[%c0, %c0_1] : memref<16x32xf32, #tpu.memory_space<vmem>>, vector<16x32xf32>
    %4 = arith.truncf %3 : vector<16x32xf32> to vector<16x32xbf16>
    %c0_2 = arith.constant 0 : index
    %c0_3 = arith.constant 0 : index
    %5 = vector.load %arg5[%c0_2, %c0_3] : memref<32x64xbf16, #tpu.memory_space<vmem>>, vector<32x64xbf16>
    %cst = arith.constant dense<0.000000e+00> : vector<16x64xf32>
    %6 = tpu.matmul %4, %5, %cst {dimension_numbers = #tpu.dot_dimension_numbers<[1], [0], [0], [1], [0, 0, 1, 1], [], []>} : vector<16x32xbf16>, vector<32x64xbf16>, vector<16x64xf32> -> vector<16x64xf32>
    %c0_4 = arith.constant 0 : index
    %c0_5 = arith.constant 0 : index
    %7 = vector.load %arg6[%c0_4, %c0_5] : memref<1x64xf32, #tpu.memory_space<vmem>>, vector<1x64xf32>
    %8 = vector.broadcast %7 : vector<1x64xf32> to vector<16x64xf32>
    %9 = arith.addf %6, %8 : vector<16x64xf32>
    %cst_6 = arith.constant 0.000000e+00 : f32
    %10 = vector.broadcast %cst_6 : f32 to vector<16x64xf32>
    %11 = arith.maximumf %9, %10 : vector<16x64xf32>
    %c0_7 = arith.constant 0 : index
    %c0_8 = arith.constant 0 : index
    %12 = vector.load %arg7[%c0_7, %c0_8] : memref<16x64xf32, #tpu.memory_space<vmem>>, vector<16x64xf32>
    tpu.vector_store %arg7[%c0_7, %c0_8], %11 {strides = array<i32>} : memref<16x64xf32, #tpu.memory_space<vmem>>, vector<16x64xf32>,
    return
  }
  func.func @transform_0(%arg0: i32, %arg1: i32) -> (i32, i32) {
    %c0_i32 = arith.constant 0 : i32
    %c0_i32_0 = arith.constant 0 : i32
    return %arg0, %c0_i32 : i32, i32
  }
  func.func @transform_1(%arg0: i32, %arg1: i32) -> (i32, i32) {
    %c0_i32 = arith.constant 0 : i32
    %c0_i32_0 = arith.constant 0 : i32
    %c0_i32_1 = arith.constant 0 : i32
    return %c0_i32, %c0_i32_0 : i32, i32
  }
  func.func @transform_2(%arg0: i32, %arg1: i32) -> (i32, i32) {
    %c0_i32 = arith.constant 0 : i32
    %c0_i32_0 = arith.constant 0 : i32
    %c0_i32_1 = arith.constant 0 : i32
    return %c0_i32, %c0_i32_0 : i32, i32
  }
  func.func @transform_3(%arg0: i32, %arg1: i32) -> (i32, i32) {
    %c0_i32 = arith.constant 0 : i32
    %c0_i32_0 = arith.constant 0 : i32
    return %c0_i32, %arg1 : i32, i32
  }
  func.func @transform_4(%arg0: i32, %arg1: i32) -> (i32, i32) {
    %c0_i32 = arith.constant 0 : i32
    %c0_i32_0 = arith.constant 0 : i32
    return %c0_i32, %arg1 : i32, i32
  }
  func.func @transform_5(%arg0: i32, %arg1: i32) -> (i32, i32) {
    %c0_i32 = arith.constant 0 : i32
    return %arg0, %arg1 : i32, i32
  }
}

module attributes {stable_mosaic.version = 11 : i64} {
  func.func @kernel(%arg0: i32, %arg1: i32, %arg2: memref<16x64xf32, #tpu.memory_space<vmem>>, %arg3: memref<64x32xbf16, #tpu.memory_space<vmem>>, %arg4: memref<1x32xf32, #tpu.memory_space<vmem>>, %arg5: memref<16x32xf32, #tpu.memory_space<vmem>>, %arg6: memref<16x32xf32, #tpu.memory_space<vmem>>) attributes {dimension_semantics = [#tpu.dimension_semantics<parallel>, #tpu.dimension_semantics<parallel>], iteration_bounds = array<i64: 1, 1>, scalar_prefetch = 0 : i64, scratch_operands = 0 : i64, tpu.core_type = #tpu.core_type<tc>, window_params = [{transform_indices = @transform_0, window_bounds = array<i64: 16, 64>}, {transform_indices = @transform_1, window_bounds = array<i64: 64, 32>}, {transform_indices = @transform_2, window_bounds = array<i64: 1, 32>}, {transform_indices = @transform_3, window_bounds = array<i64: 16, 32>}, {transform_indices = @transform_4, window_bounds = array<i64: 16, 32>}]} {
    %c0 = arith.constant 0 : index
    %c0_0 = arith.constant 0 : index
    %0 = vector.load %arg2[%c0, %c0_0] : memref<16x64xf32, #tpu.memory_space<vmem>>, vector<16x64xf32>
    %1 = arith.truncf %0 : vector<16x64xf32> to vector<16x64xbf16>
    %c0_1 = arith.constant 0 : index
    %c0_2 = arith.constant 0 : index
    %2 = vector.load %arg3[%c0_1, %c0_2] : memref<64x32xbf16, #tpu.memory_space<vmem>>, vector<64x32xbf16>
    %cst = arith.constant dense<0.000000e+00> : vector<16x32xf32>
    %3 = tpu.matmul %1, %2, %cst {dimension_numbers = #tpu.dot_dimension_numbers<[1], [0], [0], [1], [0, 0, 1, 1], [], []>} : vector<16x64xbf16>, vector<64x32xbf16>, vector<16x32xf32> -> vector<16x32xf32>
    %c0_3 = arith.constant 0 : index
    %c0_4 = arith.constant 0 : index
    %4 = vector.load %arg4[%c0_3, %c0_4] : memref<1x32xf32, #tpu.memory_space<vmem>>, vector<1x32xf32>
    %5 = vector.broadcast %4 : vector<1x32xf32> to vector<16x32xf32>
    %6 = arith.addf %3, %5 : vector<16x32xf32>
    %c0_5 = arith.constant 0 : index
    %c0_6 = arith.constant 0 : index
    %7 = vector.load %arg5[%c0_5, %c0_6] : memref<16x32xf32, #tpu.memory_space<vmem>>, vector<16x32xf32>
    %8 = arith.addf %6, %7 : vector<16x32xf32>
    %c0_7 = arith.constant 0 : index
    %c0_8 = arith.constant 0 : index
    %9 = vector.load %arg6[%c0_7, %c0_8] : memref<16x32xf32, #tpu.memory_space<vmem>>, vector<16x32xf32>
    tpu.vector_store %arg6[%c0_7, %c0_8], %8 {strides = array<i32>} : memref<16x32xf32, #tpu.memory_space<vmem>>, vector<16x32xf32>,
    return
  }
  func.func @transform_0(%arg0: i32, %arg1: i32) -> (i32, i32) {
    %c0_i32 = arith.constant 0 : i32
    %c0_i32_0 = arith.constant 0 : i32
    return %arg0, %c0_i32 : i32, i32
  }
  func.func @transform_1(%arg0: i32, %arg1: i32) -> (i32, i32) {
    %c0_i32 = arith.constant 0 : i32
    %c0_i32_0 = arith.constant 0 : i32
    return %c0_i32, %arg1 : i32, i32
  }
  func.func @transform_2(%arg0: i32, %arg1: i32) -> (i32, i32) {
    %c0_i32 = arith.constant 0 : i32
    %c0_i32_0 = arith.constant 0 : i32
    return %c0_i32, %arg1 : i32, i32
  }
  func.func @transform_3(%arg0: i32, %arg1: i32) -> (i32, i32) {
    %c0_i32 = arith.constant 0 : i32
    return %arg0, %arg1 : i32, i32
  }
  func.func @transform_4(%arg0: i32, %arg1: i32) -> (i32, i32) {
    %c0_i32 = arith.constant 0 : i32
    return %arg0, %arg1 : i32, i32
  }
}

module attributes {stable_mosaic.version = 11 : i64} {
  func.func @kernel(%arg0: i32, %arg1: i32, %arg2: memref<16x64xf32, #tpu.memory_space<vmem>>, %arg3: memref<64x32xbf16, #tpu.memory_space<vmem>>, %arg4: memref<1x32xf32, #tpu.memory_space<vmem>>, %arg5: memref<16x32xf32, #tpu.memory_space<vmem>>, %arg6: memref<1x32xf32, #tpu.memory_space<vmem>>, %arg7: memref<1x32xf32, #tpu.memory_space<vmem>>, %arg8: memref<16x32xf32, #tpu.memory_space<vmem>>) attributes {dimension_semantics = [#tpu.dimension_semantics<parallel>, #tpu.dimension_semantics<parallel>], iteration_bounds = array<i64: 1, 1>, scalar_prefetch = 0 : i64, scratch_operands = 0 : i64, tpu.core_type = #tpu.core_type<tc>, window_params = [{transform_indices = @transform_0, window_bounds = array<i64: 16, 64>}, {transform_indices = @transform_1, window_bounds = array<i64: 64, 32>}, {transform_indices = @transform_2, window_bounds = array<i64: 1, 32>}, {transform_indices = @transform_3, window_bounds = array<i64: 16, 32>}, {transform_indices = @transform_4, window_bounds = array<i64: 1, 32>}, {transform_indices = @transform_5, window_bounds = array<i64: 1, 32>}, {transform_indices = @transform_6, window_bounds = array<i64: 16, 32>}]} {
    %c0 = arith.constant 0 : index
    %c0_0 = arith.constant 0 : index
    %0 = vector.load %arg2[%c0, %c0_0] : memref<16x64xf32, #tpu.memory_space<vmem>>, vector<16x64xf32>
    %1 = arith.truncf %0 : vector<16x64xf32> to vector<16x64xbf16>
    %c0_1 = arith.constant 0 : index
    %c0_2 = arith.constant 0 : index
    %2 = vector.load %arg3[%c0_1, %c0_2] : memref<64x32xbf16, #tpu.memory_space<vmem>>, vector<64x32xbf16>
    %cst = arith.constant dense<0.000000e+00> : vector<16x32xf32>
    %3 = tpu.matmul %1, %2, %cst {dimension_numbers = #tpu.dot_dimension_numbers<[1], [0], [0], [1], [0, 0, 1, 1], [], []>} : vector<16x64xbf16>, vector<64x32xbf16>, vector<16x32xf32> -> vector<16x32xf32>
    %c0_3 = arith.constant 0 : index
    %c0_4 = arith.constant 0 : index
    %4 = vector.load %arg4[%c0_3, %c0_4] : memref<1x32xf32, #tpu.memory_space<vmem>>, vector<1x32xf32>
    %5 = vector.broadcast %4 : vector<1x32xf32> to vector<16x32xf32>
    %6 = arith.addf %3, %5 : vector<16x32xf32>
    %c0_5 = arith.constant 0 : index
    %c0_6 = arith.constant 0 : index
    %7 = vector.load %arg5[%c0_5, %c0_6] : memref<16x32xf32, #tpu.memory_space<vmem>>, vector<16x32xf32>
    %8 = arith.addf %6, %7 : vector<16x32xf32>
    %cst_7 = arith.constant dense<0.000000e+00> : vector<16xf32>
    %9 = vector.multi_reduction <add>, %8, %cst_7 [1] : vector<16x32xf32> to vector<16xf32>
    %10 = vector.shape_cast %9 : vector<16xf32> to vector<16x1xf32>
    %cst_8 = arith.constant 3.200000e+01 : f32
    %11 = vector.broadcast %cst_8 : f32 to vector<16x1xf32>
    %12 = arith.divf %10, %11 : vector<16x1xf32>
    %13 = vector.broadcast %12 : vector<16x1xf32> to vector<16x32xf32>
    %14 = arith.subf %8, %13 : vector<16x32xf32>
    %15 = arith.mulf %14, %14 : vector<16x32xf32>
    %cst_9 = arith.constant dense<0.000000e+00> : vector<16xf32>
    %16 = vector.multi_reduction <add>, %15, %cst_9 [1] : vector<16x32xf32> to vector<16xf32>
    %17 = vector.shape_cast %16 : vector<16xf32> to vector<16x1xf32>
    %cst_10 = arith.constant 3.100000e+01 : f32
    %18 = vector.broadcast %cst_10 : f32 to vector<16x1xf32>
    %19 = arith.divf %17, %18 : vector<16x1xf32>
    %20 = math.sqrt %19 : vector<16x1xf32>
    %cst_11 = arith.constant 9.99999997E-7 : f32
    %21 = vector.broadcast %cst_11 : f32 to vector<16x1xf32>
    %22 = arith.addf %20, %21 : vector<16x1xf32>
    %23 = tpu.reciprocal %22 {approx = true} : vector<16x1xf32> -> vector<16x1xf32>
    %c0_12 = arith.constant 0 : index
    %c0_13 = arith.constant 0 : index
    %24 = vector.load %arg6[%c0_12, %c0_13] : memref<1x32xf32, #tpu.memory_space<vmem>>, vector<1x32xf32>
    %25 = vector.broadcast %12 : vector<16x1xf32> to vector<16x32xf32>
    %26 = arith.subf %8, %25 : vector<16x32xf32>
    %27 = vector.broadcast %24 : vector<1x32xf32> to vector<16x32xf32>
    %28 = arith.mulf %27, %26 : vector<16x32xf32>
    %29 = vector.broadcast %23 : vector<16x1xf32> to vector<16x32xf32>
    %30 = arith.mulf %28, %29 : vector<16x32xf32>
    %c0_14 = arith.constant 0 : index
    %c0_15 = arith.constant 0 : index
    %31 = vector.load %arg7[%c0_14, %c0_15] : memref<1x32xf32, #tpu.memory_space<vmem>>, vector<1x32xf32>
    %32 = vector.broadcast %31 : vector<1x32xf32> to vector<16x32xf32>
    %33 = arith.addf %30, %32 : vector<16x32xf32>
    %c0_16 = arith.constant 0 : index
    %c0_17 = arith.constant 0 : index
    %34 = vector.load %arg8[%c0_16, %c0_17] : memref<16x32xf32, #tpu.memory_space<vmem>>, vector<16x32xf32>
    tpu.vector_store %arg8[%c0_16, %c0_17], %33 {strides = array<i32>} : memref<16x32xf32, #tpu.memory_space<vmem>>, vector<16x32xf32>,
    return
  }
  func.func @transform_0(%arg0: i32, %arg1: i32) -> (i32, i32) {
    %c0_i32 = arith.constant 0 : i32
    %c0_i32_0 = arith.constant 0 : i32
    return %arg0, %c0_i32 : i32, i32
  }
  func.func @transform_1(%arg0: i32, %arg1: i32) -> (i32, i32) {
    %c0_i32 = arith.constant 0 : i32
    %c0_i32_0 = arith.constant 0 : i32
    return %c0_i32, %arg1 : i32, i32
  }
  func.func @transform_2(%arg0: i32, %arg1: i32) -> (i32, i32) {
    %c0_i32 = arith.constant 0 : i32
    %c0_i32_0 = arith.constant 0 : i32
    return %c0_i32, %arg1 : i32, i32
  }
  func.func @transform_3(%arg0: i32, %arg1: i32) -> (i32, i32) {
    %c0_i32 = arith.constant 0 : i32
    return %arg0, %arg1 : i32, i32
  }
  func.func @transform_4(%arg0: i32, %arg1: i32) -> (i32, i32) {
    %c0_i32 = arith.constant 0 : i32
    %c0_i32_0 = arith.constant 0 : i32
    return %c0_i32, %arg1 : i32, i32
  }
  func.func @transform_5(%arg0: i32, %arg1: i32) -> (i32, i32) {
    %c0_i32 = arith.constant 0 : i32
    %c0_i32_0 = arith.constant 0 : i32
    return %c0_i32, %arg1 : i32, i32
  }
  func.func @transform_6(%arg0: i32, %arg1: i32) -> (i32, i32) {
    %c0_i32 = arith.constant 0 : i32
    return %arg0, %arg1 : i32, i32
  }
}

</mosaic_0001>

<bundles_post_ra>
// kernel: decoder_forward.18
= control target key start
LH: loop header
LB: loop body
LE: loop exit
PB: predicated region body
PF: predicated region fallthrough
CT: control target
= control target key end

     0   :  { %vm24_vm0 = vcmask 261120   ;;  %v186_v14 = vmov 0.0   ;;  %vm187_vm1 = vmmov 0   ;;  %vm151_vm6 = vcmask 785408   ;;  %s244_s0 = inlined_call_operand.vmem [shape: f32[16,32], index: 0, kind: input, shape index: {}]   ;;  %s245_s3 = inlined_call_operand.vmem [shape: bf16[32,96], index: 3, kind: input, shape index: {}]   ;;  %s246_s1 = inlined_call_operand.vmem [shape: f32[1,32], index: 1, kind: input, shape index: {}]   ;;  %s247_s2 = inlined_call_operand.vmem [shape: f32[1,32], index: 2, kind: input, shape index: {}]   ;;  %s248_s4 = inlined_call_operand.vmem [shape: f32[16,96], index: 4, kind: output, shape index: {}]  }
   0x1   :  { %v22_v0 = vld [vmem:[%s244_s0] sm:$0xff]  ;;  %v23_v1 = vld [vmem:[%s244_s0 + $0x8] sm:$0xff]  ;;  %166 = vmatprep.subr.bf16.mxu0 %v186_v14  ;;  %170 = vmatprep.mubr.msk.bf16.mxu0 %vm187_vm1, %v186_v14 }
   0x2   :  { %v25_v2 = vsel %vm24_vm0, %v22_v0, 0.0  ;;  %v28_v3 = vsel %vm24_vm0, %v23_v1, 0.0  ;;  %v176_v15 = vld [vmem:[%s245_s3] sm:$0xff]   ;;  %v177_v16 = vld [vmem:[%s245_s3 + $0x8] sm:$0xff]  }
   0x3   :  { %26 = vadd.xlane.f32.xlu0 %v25_v2  ;;  %167 = vmatpush3.bf16.msra.mxu0 %v176_v15  ;;  %v158_v33 = vld [vmem:[%s246_s1] ss:$0 sm:$0xff] }
   0x4   :  { %168 = vmatprep.subr.bf16.mxu0 %v186_v14  ;;  %v159_v36 = vld [vmem:[%s247_s2] ss:$0 sm:$0xff] }
   0x7   :  { %29 = vadd.xlane.f32.xlu0 %v28_v3  ;;  %169 = vmatpush3.bf16.msra.mxu0 %v177_v16 }
  0x90   :  { %v27_v4 = vpop.xlane.xlu0 %26 }
  0x91   :  { %v32_v5 = vmul.f32 0.03125, %v27_v4 }
  0x93   :  { %v34_v6 = vsub.f32 %v22_v0, %v32_v5 }
  0x94   :  { %v30_v7 = vpop.xlane.xlu0 %29 }
  0x95   :  { %v33_v8 = vmul.f32 0.03125, %v30_v7  ;;  %v36_v9 = vmul.f32 %v34_v6, %v34_v6  ;;  %v72_v34 = vmul.f32 %v158_v33, %v34_v6 }
  0x97   :  { %v35_v10 = vsub.f32 %v23_v1, %v33_v8  ;;  %v38_v11 = vsel %vm24_vm0, %v36_v9, 0.0 }
  0x98   :  { %39 = vadd.xlane.f32.xlu1 %v38_v11 }
  0x99   :  { %v37_v12 = vmul.f32 %v35_v10, %v35_v10  ;;  %v73_v38 = vmul.f32 %v158_v33, %v35_v10 }
  0x9b   :  { %v41_v13 = vsel %vm24_vm0, %v37_v12, 0.0 }
  0x9c   :  { %42 = vadd.xlane.f32.xlu1 %v41_v13 }
 0x125   :  { %v40_v17 = vpop.xlane.xlu1 %39 }
 0x126   :  { %v45_v18 = vmul.f32 0.032258064, %v40_v17 }
 0x128   :  { %178 = vrsqrt.f32 %v45_v18  ;;  %vm49_vm2 = vcmp.eq.f32.partialorder %v45_v18, inf  ;;  %v52_v23 = vand.u32 2147483648, %v45_v18  ;;  %vm51_vm3 = vcmp.eq.f32.partialorder %v45_v18, 0.0 }
 0x129   :  { %v43_v19 = vpop.xlane.xlu1 %42 }
 0x12a   :  { %v46_v20 = vmul.f32 0.032258064, %v43_v19 }
 0x12c   :  { %180 = vrsqrt.f32 %v46_v20  ;;  %vm56_vm4 = vcmp.eq.f32.partialorder %v46_v20, inf  ;;  %v59_v29 = vand.u32 2147483648, %v46_v20  ;;  %vm58_vm5 = vcmp.eq.f32.partialorder %v46_v20, 0.0 }
 0x132   :  { %v179_v21 = vpop.eup %178 }
 0x133   :  { %v48_v22 = vmul.f32 %v179_v21, %v45_v18 }
 0x135   :  { %v50_v24 = vsel %vm49_vm2, %v45_v18, %v48_v22 }
 0x136   :  { %v181_v25 = vpop.eup %180  ;;  %v53_v26 = vsel %vm51_vm3, %v52_v23, %v50_v24 }
 0x137   :  { %v61_v27 = vadd.f32 1e-06, %v53_v26  ;;  %v55_v28 = vmul.f32 %v181_v25, %v46_v20 }
 0x139   :  { %182 = vrcp.f32 %v61_v27  ;;  %v57_v30 = vsel %vm56_vm4, %v46_v20, %v55_v28 }
 0x13a   :  { %v60_v31 = vsel %vm58_vm5, %v59_v29, %v57_v30 }
 0x13b   :  { %v62_v32 = vadd.f32 1e-06, %v60_v31 }
 0x13d   :  { %184 = vrcp.f32 %v62_v32 }
 0x143   :  { %v183_v35 = vpop.eup %182 }
 0x144   :  { %v74_v37 = vmul.f32 %v183_v35, %v72_v34 }
 0x146   :  { %v83_v39 = vadd.f32 %v159_v36, %v74_v37 }
 0x147   :  { %v185_v40 = vpop.eup %184 }
 0x148   :  { %85 = vst.msk [vmem:[#allocation2] sm:$0xff] %vm24_vm0, %v83_v39  ;;  %v75_v41 = vmul.f32 %v185_v40, %v73_v38 }
 0x14a   :  { %v84_v42 = vadd.f32 %v159_v36, %v75_v41 }
 0x14c   :  { %86 = vst.msk [vmem:[#allocation2 + $0x8] sm:$0xff] %vm24_vm0, %v84_v42 }
 0x14f   :  { %v87_v43 = vld [vmem:[#allocation2] sm:$0xff] }
 0x153   :  { %v88_v44 = vld [vmem:[#allocation2 + $0x8] sm:$0xff] }
 0x154   :  { %v89_v45 = vpack.c.bf16 %v88_v44, %v87_v43 }
 0x156   :  { %171 = vmatmul.mubr.msk.bf16.vlgmr.msra.gmra.mrb[0].mxu0 %vm24_vm0, %v89_v45 }
 0x229   :  { %v144_v46 = vpop.f32.mrb[0].mxu0 }
 0x22a   :  { %152 = vst.msk [vmem:[%s248_s4] sm:$0xff] %vm151_vm6, %v144_v46  ;;  %v172_v47 = vpop.f32.mrb[1].mxu0 }
 0x22b   :  { %v147_v48 = vpop.f32.mrb[2].mxu0 }
 0x22c   :  { %153 = vst.msk [vmem:[%s248_s4 + $0x8] sm:$0xff] %vm151_vm6, %v147_v48  ;;  %v173_v49 = vpop.f32.mrb[3].mxu0 }

// kernel: decoder_forward.20
= control target key start
LH: loop header
LB: loop body
LE: loop exit
PB: predicated region body
PF: predicated region fallthrough
CT: control target
= control target key end

     0   :  { %v105_v0 = vmov 0.0   ;;  %vm106_vm0 = vmmov 0   ;;  %vm36_vm1 = vcmask 261120   ;;  %s151_s1 = inlined_call_operand.vmem [shape: bf16[32,32], index: 1, kind: input, shape index: {}]   ;;  %s152_s0 = inlined_call_operand.vmem [shape: f32[16,32], index: 0, kind: input, shape index: {}]   ;;  %s153_s2 = inlined_call_operand.vmem [shape: f32[16,32], index: 2, kind: input, shape index: {}]   ;;  %s154_s3 = inlined_call_operand.vmem [shape: f32[16,32], index: 3, kind: output, shape index: {}]  }
   0x1   :  { %93 = vmatprep.subr.bf16.mxu0 %v105_v0  ;;  %v103_v1 = vld [vmem:[%s151_s1] sm:$0xff]   ;;  %97 = vmatprep.mubr.msk.bf16.mxu0 %vm106_vm0, %v105_v0  ;;  %v104_v2 = vld [vmem:[%s151_s1 + $0x8] sm:$0xff]  }
   0x2   :  { %94 = vmatpush3.bf16.msra.mxu0 %v103_v1  ;;  %v15_v3 = vld [vmem:[%s152_s0] sm:$0xff]  ;;  %v16_v4 = vld [vmem:[%s152_s0 + $0x8] sm:$0xff] }
   0x3   :  { %95 = vmatprep.subr.bf16.mxu0 %v105_v0  ;;  %v17_v5 = vpack.c.bf16 %v16_v4, %v15_v3  ;;  %v22_v6 = vld [vmem:[%s153_s2] sm:$0xff]  ;;  %v23_v8 = vld [vmem:[%s153_s2 + $0x8] sm:$0xff] }
   0x6   :  { %96 = vmatpush3.bf16.msra.mxu0 %v104_v2 }
   0x9   :  { %98 = vmatmul.mubr.msk.bf16.vlgmr.msra.gmra.mrb[0].mxu0 %vm36_vm1, %v17_v5 }
  0xdc   :  { %v74_v7 = vpop.f32.mrb[0].mxu0 }
  0xdd   :  { %v75_v9 = vadd.f32 %v74_v7, %v22_v6  ;;  %v99_v10 = vpop.f32.mrb[1].mxu0 }
  0xde   :  { %v77_v11 = vpop.f32.mrb[2].mxu0 }
  0xdf   :  { %81 = vst.msk [vmem:[%s154_s3] sm:$0xff] %vm36_vm1, %v75_v9  ;;  %v78_v12 = vadd.f32 %v77_v11, %v23_v8  ;;  %v100_v13 = vpop.f32.mrb[3].mxu0 }
  0xe1   :  { %82 = vst.msk [vmem:[%s154_s3 + $0x8] sm:$0xff] %vm36_vm1, %v78_v12 }

// kernel: decoder_forward.19
= control target key start
LH: loop header
LB: loop body
LE: loop exit
PB: predicated region body
PF: predicated region fallthrough
CT: control target
= control target key end

     0   :  { %s941_s9 = smov 0   ;;  %s943_s10 = smov 0   ;;  %s1053_s0 = inlined_call_operand.vmem [shape: f32[2,8,32], index: 0, kind: input, shape index: {}]   ;;  %s1054_s1 = inlined_call_operand.vmem [shape: f32[2,8,64], index: 1, kind: input, shape index: {}]   ;;  %s1055_s2 = inlined_call_operand.vmem [shape: f32[2,8,32], index: 2, kind: output, shape index: {}]  }
   0x1   :  { %s945_s11 = smov 0  }
   0x2 LB: > { %s24_s12 = sadd.s32 1, %s907_s10  ;;  %p758_p0 = scmp.ge.s32.totalorder %s911_s11, 1  ;;  %s911_s11 = sphi %s945_s11, %s12_s11   ;;  %s907_s10 = sphi %s943_s10, %s1057_s10   ;;  %s903_s9 = sphi %s941_s9, %s1056_s9  }
   0x3   : > { %p26_p1 = scmp.ge.s32.totalorder %s24_s12, 2  ;;  %p139_p2 = scmp.lt.s32.totalorder %s911_s11, 3 }
   0x5   : > { %s1059_s12 = smov (%p26_p1, %s24_s12), 0  ;;  %p140_p3 = pnand %p758_p0, %p139_p2 }
   0x6   : > { %p169_p4 = scmp.lt.s32.totalorder (!%p140_p3), %s903_s9, 1  ;;  %v913_v0 = vmov (!%p140_p3), 0.0   ;;  %vm914_vm0 = vmmov (!%p140_p3), 0   ;;  %vm201_vm1 = vcmask (!%p140_p3), 64512   ;;  %v191_v6 = vlaneseq (!%p140_p3)  ;;  %s916_s20 = smov (!%p140_p3), 96  }
   0x7   : > { %143 = sbr.rel (%p140_p3) target bundleno = 1445 (0x5a5), region = 28  ;;  %788 = vmatprep.subr.bf16.mxu0 (!%p140_p3), %v913_v0  ;;  %790 = vmatprep.mubr.msk.bf16.mxu0 (!%p140_p3), %vm914_vm0, %v913_v0  ;;  %v915_v10 = vmov (!%p140_p3), -1e+09   ;;  %s917_s21 = smov (!%p140_p3), 120   ;;  %vm268_vm3 = vcmask (!%p140_p3), 1043456   ;;  %vm430_vm4 = vcmask (!%p140_p3), 130112  }
   0x8   : > { %794 = vmatprep.subr.bf16.mxu1 (!%p140_p3), %v913_v0  ;;  %796 = vmatprep.mubr.msk.bf16.mxu1 (!%p140_p3), %vm914_vm0, %v913_v0  ;;  %v192_v7 = vshrl.u32 (!%p140_p3), %v191_v6, 7  ;;  %v196_v8 = vand.u32 (!%p140_p3), 127, %v191_v6  ;;  %s918_s22 = smov (!%p140_p3), 112   ;;  %s919_s23 = smov (!%p140_p3), 104   ;;  %vm548_vm5 = vcmask (!%p140_p3), 195712   ;;  %vm666_vm6 = vcmask (!%p140_p3), 261312  }
   0x9   : > { %s920_s27 = smov (!%p140_p3), 88   ;;  %s921_s28 = smov (!%p140_p3), 72  }
   0xa   : > { %vm197_vm2 = vcmp.ge.s32.totalorder (!%p140_p3), %v192_v7, %v196_v8  ;;  %s922_s29 = smov (!%p140_p3), 80   ;;  %s923_s30 = smov (!%p140_p3), 8  }
   0xb   : > { %v983_v11 = vsel (!%p140_p3), %vm197_vm2, 0.0, %v915_v10  ;;  %s924_s3 = smov (!%p140_p3), 16   ;;  %s925_s4 = smov (!%p140_p3), 24  }
   0xe   : > { %s1061_s9 = smov (!%p169_p4, %s903_s9), 1 }
   0xf   : > { %s965_s13 = sshll.u32 %s1061_s9, 3 }
  0x10   : > { %s179_s16 = scalar_lea.vmem %s1054_s1, %s965_s13  ;;  %s175_s19 = scalar_lea.vmem %s1053_s0, %s965_s13 }
  0x11   : > { %v189_v1 = vld [vmem:[%s179_s16] sm:$0xff]  ;;  %s1013_s26 = scalar_lea.vmem %s1055_s2, %s965_s13 }
  0x12   : > { %v971_v2 = vpack.c.bf16 %v189_v1, %v189_v1  ;;  %v188_v4 = vld [vmem:[%s175_s19] sm:$0xff] }
  0x13   : > { %v199_v5 = vpack.c.bf16 %v188_v4, %v188_v4 }
  0x14   : > { %v206_v3 = vsel %vm201_vm1, %v971_v2, 0  ;;  %263 = vrot.lane.b32.xlu1 %v971_v2, %s916_s20 }
  0x15   : > { %789 = vmatpush3.bf16.xpose.msra.mxu0 %v206_v3 }
  0x16   : > { %806 = vmatprep.subr.bf16.mxu0 %v913_v0 }
  0x18   : > { %316 = vrot.lane.b32.xlu1 %v971_v2, %s917_s21 }
  0x1c   : > { %791 = vmatmul.mubr.msk.bf16.vlgmr.msra.gmra.mrb[0].mxu0 %vm201_vm1, %v199_v5  ;;  %434 = vrot.lane.b32.xlu1 %v971_v2, %s918_s22 }
  0x1d   : > { %808 = vmatprep.mubr.msk.bf16.mxu0 %vm914_vm0, %v913_v0 }
  0x20   : > { %432 = vrot.lane.b32.xlu1 %v199_v5, %s918_s22 }
  0x24   : > { %552 = vrot.lane.b32.xlu1 %v971_v2, %s919_s23 }
  0x28   : > { %550 = vrot.lane.b32.xlu1 %v199_v5, %s919_s23 }
  0x86   : > { %v264_v23 = vpop.permute.xlu1 %263 }
  0x87   : > { %v270_v24 = vsel %vm268_vm3, %v264_v23, 0 }
  0x88   : > { %795 = vmatpush3.bf16.msra.mxu1 %v270_v24 }
  0x89   : > { %800 = vmatprep.subr.bf16.mxu1 %v913_v0 }
  0x8a   : > { %v317_v27 = vpop.permute.xlu1 %316 }
  0x8b   : > { %v322_v29 = vsel %vm201_vm1, %v317_v27, 0 }
  0x8e   : > { %v435_v31 = vpop.permute.xlu1 %434 }
  0x8f   : > { %v440_v34 = vsel %vm201_vm1, %v435_v31, 0 }
  0x92   : > { %v433_v33 = vpop.permute.xlu1 %432 }
  0x96   : > { %v553_v35 = vpop.permute.xlu1 %552 }
  0x97   : > { %v558_v36 = vsel %vm201_vm1, %v553_v35, 0 }
  0x9a   : > { %v551_v37 = vpop.permute.xlu1 %550 }
  0xef   : > { %v242_v9 = vpop.f32.mrb[0].mxu0 }
  0xf0   : > { %v248_v12 = vmul.f32 0.35355338, %v242_v9  ;;  %v792_v13 = vpop.f32.mrb[1].mxu0 }
  0xf1   : > { %v245_v14 = vpop.f32.mrb[2].mxu0 }
  0xf2   : > { %v793_v15 = vpop.f32.mrb[3].mxu0  ;;  %v249_v16 = vadd.f32 %v248_v12, %v983_v11 }
  0xf4   : > { %v250_v17 = vsel %vm201_vm1, %v249_v16, -inf }
  0xf5   : > { %251 = vmax.xlane.f32.xlu0 %v250_v17 }
 0x182   : > { %v252_v18 = vpop.xlane.xlu0 %251 }
 0x183   : > { %v253_v19 = vsub.f32 %v249_v16, %v252_v18 }
 0x185   : > { %v254_v20 = vmul.f32 1.442695, %v253_v19 }
 0x187   : > { %873 = vpow2.f32 %v254_v20 }
 0x191   : > { %v874_v21 = vpop.eup %873 }
 0x192   : > { %v256_v22 = vsel %vm201_vm1, %v874_v21, 0.0 }
 0x193   : > { %257 = vadd.xlane.f32.xlu0 %v256_v22 }
 0x1a9   : > { %314 = vrot.lane.b32.xlu0 %v199_v5, %s917_s21 }
 0x220   : > { %v258_v25 = vpop.xlane.xlu0 %257 }
 0x221   : > { %875 = vrcp.f32 %v258_v25 }
 0x224   : > { %v315_v32 = vpop.permute.xlu0 %314 }
 0x22b   : > { %v876_v26 = vpop.eup %875 }
 0x22c   : > { %v260_v28 = vmul.f32 %v876_v26, %v874_v21 }
 0x22e   : > { %v261_v30 = vpack.c.bf16 %v260_v28, %v260_v28 }
 0x230   : > { %797 = vmatmul.mubr.msk.bf16.vlgmr.msra.gmra.mrb[0].mxu1 %vm201_vm1, %v261_v30 }
 0x231   : > { %801 = vmatpush3.bf16.xpose.msra.mxu1 %v322_v29  ;;  %802 = vmatprep.mubr.msk.bf16.mxu1 %vm914_vm0, %v913_v0 }
 0x232   : > { %812 = vmatprep.subr.bf16.mxu1 %v913_v0 }
 0x238   : > { %803 = vmatmul.mubr.msk.bf16.vlgmr.msra.gmra.mrb[4].mxu1 %vm201_vm1, %v315_v32 }
 0x239   : > { %813 = vmatpush3.bf16.xpose.msra.mxu1 %v440_v34  ;;  %814 = vmatprep.mubr.msk.bf16.mxu1 %vm914_vm0, %v913_v0 }
 0x23a   : > { %824 = vmatprep.subr.bf16.mxu1 %v913_v0 }
 0x240   : > { %815 = vmatmul.mubr.msk.bf16.vlgmr.msra.gmra.mrb[8].mxu1 %vm201_vm1, %v433_v33 }
 0x241   : > { %825 = vmatpush3.bf16.xpose.msra.mxu1 %v558_v36  ;;  %826 = vmatprep.mubr.msk.bf16.mxu1 %vm914_vm0, %v913_v0 }
 0x248   : > { %827 = vmatmul.mubr.msk.bf16.vlgmr.msra.gmra.mrb[12].mxu1 %vm201_vm1, %v551_v37 }
 0x303   : > { %v306_v38 = vpop.f32.mrb[0].mxu1 }
 0x304   : > { %312 = vst.msk [vmem:[%s1013_s26] sm:$0xff] %vm201_vm1, %v306_v38  ;;  %v798_v39 = vpop.f32.mrb[1].mxu1 }
 0x305   : > { %v309_v40 = vpop.f32.mrb[2].mxu1 }
 0x306   : > { %v799_v41 = vpop.f32.mrb[3].mxu1 }
 0x30b   : > { %v358_v42 = vpop.f32.mrb[4].mxu1 }
 0x30c   : > { %v364_v43 = vmul.f32 0.35355338, %v358_v42  ;;  %v804_v44 = vpop.f32.mrb[5].mxu1 }
 0x30d   : > { %v361_v45 = vpop.f32.mrb[6].mxu1 }
 0x30e   : > { %v805_v46 = vpop.f32.mrb[7].mxu1  ;;  %v365_v47 = vadd.f32 %v364_v43, %v983_v11 }
 0x310   : > { %v366_v48 = vsel %vm201_vm1, %v365_v47, -inf }
 0x311   : > { %367 = vmax.xlane.f32.xlu1 %v366_v48 }
 0x313   : > { %v476_v49 = vpop.f32.mrb[8].mxu1 }
 0x314   : > { %v482_v50 = vmul.f32 0.35355338, %v476_v49  ;;  %v816_v51 = vpop.f32.mrb[9].mxu1 }
 0x315   : > { %v479_v52 = vpop.f32.mrb[10].mxu1 }
 0x316   : > { %v817_v53 = vpop.f32.mrb[11].mxu1  ;;  %v483_v54 = vadd.f32 %v482_v50, %v983_v11 }
 0x318   : > { %v484_v55 = vsel %vm201_vm1, %v483_v54, -inf }
 0x319   : > { %485 = vmax.xlane.f32.xlu0 %v484_v55 }
 0x31b   : > { %v594_v56 = vpop.f32.mrb[12].mxu1 }
 0x31c   : > { %v600_v57 = vmul.f32 0.35355338, %v594_v56  ;;  %v828_v58 = vpop.f32.mrb[13].mxu1 }
 0x31d   : > { %v597_v59 = vpop.f32.mrb[14].mxu1 }
 0x31e   : > { %v829_v60 = vpop.f32.mrb[15].mxu1  ;;  %v601_v61 = vadd.f32 %v600_v57, %v983_v11 }
 0x320   : > { %v602_v62 = vsel %vm201_vm1, %v601_v61, -inf }
 0x321   : > { %603 = vmax.xlane.f32.xlu1 %v602_v62 }
 0x332   : > { %378 = vrot.lane.b32.xlu1 %v971_v2, %s920_s27 }
 0x39e   : > { %v368_v63 = vpop.xlane.xlu1 %367 }
 0x39f   : > { %v369_v1 = vsub.f32 %v365_v47, %v368_v63 }
 0x3a1   : > { %v370_v3 = vmul.f32 1.442695, %v369_v1 }
 0x3a3   : > { %877 = vpow2.f32 %v370_v3 }
 0x3a6   : > { %v486_v4 = vpop.xlane.xlu0 %485 }
 0x3a7   : > { %v487_v5 = vsub.f32 %v483_v54, %v486_v4 }
 0x3a9   : > { %v488_v6 = vmul.f32 1.442695, %v487_v5 }
 0x3ab   : > { %879 = vpow2.f32 %v488_v6 }
 0x3ad   : > { %v878_v7 = vpop.eup %877 }
 0x3ae   : > { %v604_v8 = vpop.xlane.xlu1 %603  ;;  %v372_v9 = vsel %vm201_vm1, %v878_v7, 0.0 }
 0x3af   : > { %v605_v10 = vsub.f32 %v601_v61, %v604_v8  ;;  %373 = vadd.xlane.f32.xlu0 %v372_v9 }
 0x3b1   : > { %v606_v11 = vmul.f32 1.442695, %v605_v10 }
 0x3b2   : > { %v379_v12 = vpop.permute.xlu1 %378 }
 0x3b3   : > { %881 = vpow2.f32 %v606_v11  ;;  %v384_v13 = vsel %vm268_vm3, %v379_v12, 0 }
 0x3b4   : > { %807 = vmatpush3.bf16.msra.mxu0 %v384_v13 }
 0x3b5   : > { %v880_v14 = vpop.eup %879  ;;  %818 = vmatprep.subr.bf16.mxu0 %v913_v0 }
 0x3b6   : > { %v490_v15 = vsel %vm201_vm1, %v880_v14, 0.0 }
 0x3b7   : > { %491 = vadd.xlane.f32.xlu1 %v490_v15 }
 0x3bd   : > { %v882_v16 = vpop.eup %881 }
 0x3be   : > { %v608_v17 = vsel %vm201_vm1, %v882_v16, 0.0 }
 0x3bf   : > { %609 = vadd.xlane.f32.xlu0 %v608_v17 }
 0x3c8   : > { %614 = vrot.lane.b32.xlu1 %v971_v2, %s921_s28 }
 0x3d5   : > { %496 = vrot.lane.b32.xlu0 %v971_v2, %s922_s29 }
 0x43c   : > { %v374_v18 = vpop.xlane.xlu0 %373 }
 0x43d   : > { %883 = vrcp.f32 %v374_v18 }
 0x444   : > { %v492_v19 = vpop.xlane.xlu1 %491 }
 0x445   : > { %885 = vrcp.f32 %v492_v19 }
 0x447   : > { %v884_v20 = vpop.eup %883 }
 0x448   : > { %v376_v21 = vmul.f32 %v884_v20, %v878_v7  ;;  %v615_v27 = vpop.permute.xlu1 %614 }
 0x449   : > { %v620_v29 = vsel %vm268_vm3, %v615_v27, 0 }
 0x44a   : > { %v377_v22 = vpack.c.bf16 %v376_v21, %v376_v21 }
 0x44c   : > { %v610_v23 = vpop.xlane.xlu0 %609  ;;  %809 = vmatmul.mubr.msk.bf16.vlgmr.msra.gmra.mrb[4].mxu0 %vm201_vm1, %v377_v22 }
 0x44d   : > { %887 = vrcp.f32 %v610_v23  ;;  %820 = vmatprep.mubr.msk.bf16.mxu0 %vm914_vm0, %v913_v0 }
 0x44f   : > { %v886_v24 = vpop.eup %885 }
 0x450   : > { %v494_v25 = vmul.f32 %v886_v24, %v880_v14  ;;  %v497_v26 = vpop.permute.xlu0 %496 }
 0x451   : > { %v502_v2 = vsel %vm268_vm3, %v497_v26, 0 }
 0x452   : > { %819 = vmatpush3.bf16.msra.mxu0 %v502_v2  ;;  %v495_v28 = vpack.c.bf16 %v494_v25, %v494_v25 }
 0x453   : > { %830 = vmatprep.subr.bf16.mxu0 %v913_v0 }
 0x455   : > { %821 = vmatmul.mubr.msk.bf16.vlgmr.msra.gmra.mrb[8].mxu0 %vm201_vm1, %v495_v28 }
 0x456   : > { %831 = vmatpush3.bf16.msra.mxu0 %v620_v29  ;;  %832 = vmatprep.mubr.msk.bf16.mxu0 %vm914_vm0, %v913_v0 }
 0x457   : > { %v888_v30 = vpop.eup %887 }
 0x458   : > { %v612_v31 = vmul.f32 %v888_v30, %v882_v16 }
 0x45a   : > { %v613_v32 = vpack.c.bf16 %v612_v31, %v612_v31 }
 0x45d   : > { %833 = vmatmul.mubr.msk.bf16.vlgmr.msra.gmra.mrb[12].mxu0 %vm201_vm1, %v613_v32 }
 0x51f   : > { %v420_v33 = vpop.f32.mrb[4].mxu0 }
 0x520   : > { %427 = vrot.lane.b32.xlu1 %v420_v33, %s923_s30  ;;  %v810_v34 = vpop.f32.mrb[5].mxu0 }
 0x521   : > { %v423_v35 = vpop.f32.mrb[6].mxu0 }
 0x522   : > { %v811_v36 = vpop.f32.mrb[7].mxu0 }
 0x528   : > { %v538_v37 = vpop.f32.mrb[8].mxu0 }
 0x529   : > { %545 = vrot.lane.b32.xlu0 %v538_v37, %s924_s3  ;;  %v822_v38 = vpop.f32.mrb[9].mxu0 }
 0x52a   : > { %v541_v39 = vpop.f32.mrb[10].mxu0 }
 0x52b   : > { %v823_v0 = vpop.f32.mrb[11].mxu0 }
 0x530   : > { %v656_v40 = vpop.f32.mrb[12].mxu0 }
 0x531   : > { %663 = vrot.lane.b32.xlu1 %v656_v40, %s925_s4  ;;  %v834_v41 = vpop.f32.mrb[13].mxu0 }
 0x532   : > { %v659_v42 = vpop.f32.mrb[14].mxu0 }
 0x533   : > { %v835_v43 = vpop.f32.mrb[15].mxu0 }
 0x592   : > { %v428_v44 = vpop.permute.xlu1 %427 }
 0x593   : > { %431 = vst.msk [vmem:[%s1013_s26] sm:$0xff] %vm430_vm4, %v428_v44 }
 0x59b   : > { %v546_v45 = vpop.permute.xlu0 %545 }
 0x59c   : > { %549 = vst.msk [vmem:[%s1013_s26] sm:$0xff] %vm548_vm5, %v546_v45 }
 0x5a3   : > { %v664_v46 = vpop.permute.xlu1 %663 }
 0x5a4   : > { %667 = vst.msk [vmem:[%s1013_s26] sm:$0xff] %vm666_vm6, %v664_v46 }
 0x5a5 PF: > { %s12_s11 = sadd.s32 1, %s911_s11   ;;  %s1056_s9 = smov %s907_s10 }
 0x5a6   : > { %p9_p5 = scmp.ge.s32.totalorder %s12_s11, 4   ;;  %s1057_s10 = smov %s1059_s12 }
 0x5a8   :  { %11 = sbr.rel (!%p9_p5) target bundleno = 2 (0x2), region = 61 }

// kernel: decoder_forward.21
= control target key start
LH: loop header
LB: loop body
LE: loop exit
PB: predicated region body
PF: predicated region fallthrough
CT: control target
= control target key end

     0   :  { %vm24_vm0 = vcmask 261120   ;;  %v185_v14 = vmov 0.0   ;;  %vm186_vm1 = vmmov 0   ;;  %s245_s0 = inlined_call_operand.vmem [shape: f32[16,32], index: 0, kind: input, shape index: {}]   ;;  %s246_s3 = inlined_call_operand.vmem [shape: bf16[32,32], index: 3, kind: input, shape index: {}]   ;;  %s247_s1 = inlined_call_operand.vmem [shape: f32[1,32], index: 1, kind: input, shape index: {}]   ;;  %s248_s2 = inlined_call_operand.vmem [shape: f32[1,32], index: 2, kind: input, shape index: {}]   ;;  %s249_s4 = inlined_call_operand.vmem [shape: f32[16,32], index: 4, kind: output, shape index: {}]  }
   0x1   :  { %v22_v0 = vld [vmem:[%s245_s0] sm:$0xff]  ;;  %v23_v1 = vld [vmem:[%s245_s0 + $0x8] sm:$0xff]  ;;  %165 = vmatprep.subr.bf16.mxu0 %v185_v14  ;;  %169 = vmatprep.mubr.msk.bf16.mxu0 %vm186_vm1, %v185_v14 }
   0x2   :  { %v25_v2 = vsel %vm24_vm0, %v22_v0, 0.0  ;;  %v28_v3 = vsel %vm24_vm0, %v23_v1, 0.0  ;;  %v175_v15 = vld [vmem:[%s246_s3] sm:$0xff]   ;;  %v176_v16 = vld [vmem:[%s246_s3 + $0x8] sm:$0xff]  }
   0x3   :  { %26 = vadd.xlane.f32.xlu0 %v25_v2  ;;  %166 = vmatpush3.bf16.msra.mxu0 %v175_v15  ;;  %v157_v33 = vld [vmem:[%s247_s1] ss:$0 sm:$0xff] }
   0x4   :  { %167 = vmatprep.subr.bf16.mxu0 %v185_v14  ;;  %v158_v36 = vld [vmem:[%s248_s2] ss:$0 sm:$0xff] }
   0x7   :  { %29 = vadd.xlane.f32.xlu0 %v28_v3  ;;  %168 = vmatpush3.bf16.msra.mxu0 %v176_v16 }
  0x90   :  { %v27_v4 = vpop.xlane.xlu0 %26 }
  0x91   :  { %v32_v5 = vmul.f32 0.03125, %v27_v4 }
  0x93   :  { %v34_v6 = vsub.f32 %v22_v0, %v32_v5 }
  0x94   :  { %v30_v7 = vpop.xlane.xlu0 %29 }
  0x95   :  { %v33_v8 = vmul.f32 0.03125, %v30_v7  ;;  %v36_v9 = vmul.f32 %v34_v6, %v34_v6  ;;  %v72_v34 = vmul.f32 %v157_v33, %v34_v6 }
  0x97   :  { %v35_v10 = vsub.f32 %v23_v1, %v33_v8  ;;  %v38_v11 = vsel %vm24_vm0, %v36_v9, 0.0 }
  0x98   :  { %39 = vadd.xlane.f32.xlu1 %v38_v11 }
  0x99   :  { %v37_v12 = vmul.f32 %v35_v10, %v35_v10  ;;  %v73_v38 = vmul.f32 %v157_v33, %v35_v10 }
  0x9b   :  { %v41_v13 = vsel %vm24_vm0, %v37_v12, 0.0 }
  0x9c   :  { %42 = vadd.xlane.f32.xlu1 %v41_v13 }
 0x125   :  { %v40_v17 = vpop.xlane.xlu1 %39 }
 0x126   :  { %v45_v18 = vmul.f32 0.032258064, %v40_v17 }
 0x128   :  { %177 = vrsqrt.f32 %v45_v18  ;;  %vm49_vm2 = vcmp.eq.f32.partialorder %v45_v18, inf  ;;  %v52_v23 = vand.u32 2147483648, %v45_v18  ;;  %vm51_vm3 = vcmp.eq.f32.partialorder %v45_v18, 0.0 }
 0x129   :  { %v43_v19 = vpop.xlane.xlu1 %42 }
 0x12a   :  { %v46_v20 = vmul.f32 0.032258064, %v43_v19 }
 0x12c   :  { %179 = vrsqrt.f32 %v46_v20  ;;  %vm56_vm4 = vcmp.eq.f32.partialorder %v46_v20, inf  ;;  %v59_v29 = vand.u32 2147483648, %v46_v20  ;;  %vm58_vm5 = vcmp.eq.f32.partialorder %v46_v20, 0.0 }
 0x132   :  { %v178_v21 = vpop.eup %177 }
 0x133   :  { %v48_v22 = vmul.f32 %v178_v21, %v45_v18 }
 0x135   :  { %v50_v24 = vsel %vm49_vm2, %v45_v18, %v48_v22 }
 0x136   :  { %v180_v25 = vpop.eup %179  ;;  %v53_v26 = vsel %vm51_vm3, %v52_v23, %v50_v24 }
 0x137   :  { %v61_v27 = vadd.f32 1e-06, %v53_v26  ;;  %v55_v28 = vmul.f32 %v180_v25, %v46_v20 }
 0x139   :  { %181 = vrcp.f32 %v61_v27  ;;  %v57_v30 = vsel %vm56_vm4, %v46_v20, %v55_v28 }
 0x13a   :  { %v60_v31 = vsel %vm58_vm5, %v59_v29, %v57_v30 }
 0x13b   :  { %v62_v32 = vadd.f32 1e-06, %v60_v31 }
 0x13d   :  { %183 = vrcp.f32 %v62_v32 }
 0x143   :  { %v182_v35 = vpop.eup %181 }
 0x144   :  { %v74_v37 = vmul.f32 %v182_v35, %v72_v34 }
 0x146   :  { %v83_v39 = vadd.f32 %v158_v36, %v74_v37 }
 0x147   :  { %v184_v40 = vpop.eup %183 }
 0x148   :  { %85 = vst.msk [vmem:[#allocation2] sm:$0xff] %vm24_vm0, %v83_v39  ;;  %v75_v41 = vmul.f32 %v184_v40, %v73_v38 }
 0x14a   :  { %v84_v42 = vadd.f32 %v158_v36, %v75_v41 }
 0x14c   :  { %86 = vst.msk [vmem:[#allocation2 + $0x8] sm:$0xff] %vm24_vm0, %v84_v42 }
 0x14f   :  { %v87_v43 = vld [vmem:[#allocation2] sm:$0xff] }
 0x153   :  { %v88_v44 = vld [vmem:[#allocation2 + $0x8] sm:$0xff] }
 0x154   :  { %v89_v45 = vpack.c.bf16 %v88_v44, %v87_v43 }
 0x156   :  { %170 = vmatmul.mubr.msk.bf16.vlgmr.msra.gmra.mrb[0].mxu0 %vm24_vm0, %v89_v45 }
 0x229   :  { %v144_v46 = vpop.f32.mrb[0].mxu0 }
 0x22a   :  { %151 = vst.msk [vmem:[%s249_s4] sm:$0xff] %vm24_vm0, %v144_v46  ;;  %v171_v47 = vpop.f32.mrb[1].mxu0 }
 0x22b   :  { %v147_v48 = vpop.f32.mrb[2].mxu0 }
 0x22c   :  { %152 = vst.msk [vmem:[%s249_s4 + $0x8] sm:$0xff] %vm24_vm0, %v147_v48  ;;  %v172_v49 = vpop.f32.mrb[3].mxu0 }

// kernel: decoder_forward.22
= control target key start
LH: loop header
LB: loop body
LE: loop exit
PB: predicated region body
PF: predicated region fallthrough
CT: control target
= control target key end

     0   :  { %v101_v0 = vmov 0.0   ;;  %vm102_vm0 = vmmov 0   ;;  %vm31_vm1 = vcmask 261120   ;;  %vm76_vm2 = vcmask 523264   ;;  %s136_s1 = inlined_call_operand.vmem [shape: bf16[32,64], index: 1, kind: input, shape index: {}]   ;;  %s137_s0 = inlined_call_operand.vmem [shape: f32[16,32], index: 0, kind: input, shape index: {}]   ;;  %s138_s2 = inlined_call_operand.vmem [shape: f32[16,64], index: 2, kind: output, shape index: {}]  }
   0x1   :  { %89 = vmatprep.subr.bf16.mxu0 %v101_v0  ;;  %v99_v1 = vld [vmem:[%s136_s1] sm:$0xff]   ;;  %93 = vmatprep.mubr.msk.bf16.mxu0 %vm102_vm0, %v101_v0  ;;  %v100_v2 = vld [vmem:[%s136_s1 + $0x8] sm:$0xff]  }
   0x2   :  { %90 = vmatpush3.bf16.msra.mxu0 %v99_v1  ;;  %v12_v3 = vld [vmem:[%s137_s0] sm:$0xff]  ;;  %v13_v4 = vld [vmem:[%s137_s0 + $0x8] sm:$0xff] }
   0x3   :  { %91 = vmatprep.subr.bf16.mxu0 %v101_v0  ;;  %v14_v5 = vpack.c.bf16 %v13_v4, %v12_v3 }
   0x6   :  { %92 = vmatpush3.bf16.msra.mxu0 %v100_v2 }
   0x9   :  { %94 = vmatmul.mubr.msk.bf16.vlgmr.msra.gmra.mrb[0].mxu0 %vm31_vm1, %v14_v5 }
  0xdc   :  { %v69_v6 = vpop.f32.mrb[0].mxu0 }
  0xdd   :  { %77 = vst.msk [vmem:[%s138_s2] sm:$0xff] %vm76_vm2, %v69_v6  ;;  %v95_v7 = vpop.f32.mrb[1].mxu0 }
  0xde   :  { %v72_v8 = vpop.f32.mrb[2].mxu0 }
  0xdf   :  { %78 = vst.msk [vmem:[%s138_s2 + $0x8] sm:$0xff] %vm76_vm2, %v72_v8  ;;  %v96_v9 = vpop.f32.mrb[3].mxu0 }

// kernel: decoder_forward.23
= control target key start
LH: loop header
LB: loop body
LE: loop exit
PB: predicated region body
PF: predicated region fallthrough
CT: control target
= control target key end

     0   :  { %s994_s12 = smov 0   ;;  %s996_s13 = smov 0   ;;  %s1110_s0 = inlined_call_operand.vmem [shape: f32[2,8,32], index: 0, kind: input, shape index: {}]   ;;  %s1111_s1 = inlined_call_operand.vmem [shape: f32[2,8,64], index: 1, kind: input, shape index: {}]   ;;  %s1112_s2 = inlined_call_operand.vmem [shape: f32[2,1,1,8], index: 2, kind: input, shape index: {}]   ;;  %s1113_s3 = inlined_call_operand.vmem [shape: f32[2,8,32], index: 3, kind: output, shape index: {}]  }
   0x1   :  { %s998_s14 = smov 0  }
   0x2 LB: > { %s25_s15 = sadd.s32 1, %s956_s13  ;;  %p808_p0 = scmp.ge.s32.totalorder %s960_s14, 1  ;;  %s960_s14 = sphi %s998_s14, %s13_s14   ;;  %s956_s13 = sphi %s996_s13, %s1115_s13   ;;  %s952_s12 = sphi %s994_s12, %s1114_s12  }
   0x3   : > { %p27_p1 = scmp.ge.s32.totalorder %s25_s15, 2  ;;  %p172_p2 = scmp.lt.s32.totalorder %s960_s14, 3 }
   0x5   : > { %s1117_s15 = smov (%p27_p1, %s25_s15), 0  ;;  %p173_p3 = pnand %p808_p0, %p172_p2 }
   0x6   : > { %p207_p4 = scmp.lt.s32.totalorder (!%p173_p3), %s952_s12, 1  ;;  %v962_v0 = vmov (!%p173_p3), 0.0   ;;  %vm963_vm0 = vmmov (!%p173_p3), 0   ;;  %vm236_vm1 = vcmask (!%p173_p3), 64512   ;;  %v285_v6 = vlaneseq (!%p173_p3)  ;;  %s964_s26 = smov (!%p173_p3), 96  }
   0x7   : > { %176 = sbr.rel (%p173_p3) target bundleno = 1445 (0x5a5), region = 32  ;;  %838 = vmatprep.subr.bf16.mxu0 (!%p173_p3), %v962_v0  ;;  %840 = vmatprep.mubr.msk.bf16.mxu0 (!%p173_p3), %vm963_vm0, %v962_v0  ;;  %s965_s27 = smov (!%p173_p3), 120   ;;  %vm309_vm3 = vcmask (!%p173_p3), 1043456   ;;  %vm471_vm4 = vcmask (!%p173_p3), 130112   ;;  %vm589_vm5 = vcmask (!%p173_p3), 195712   ;;  %vm707_vm6 = vcmask (!%p173_p3), 261312  }
   0x8   : > { %844 = vmatprep.subr.bf16.mxu1 (!%p173_p3), %v962_v0  ;;  %846 = vmatprep.mubr.msk.bf16.mxu1 (!%p173_p3), %vm963_vm0, %v962_v0  ;;  %v286_v8 = vshrl.u32 (!%p173_p3), %v285_v6, 7  ;;  %s966_s28 = smov (!%p173_p3), 112   ;;  %s967_s29 = smov (!%p173_p3), 104  }
   0x9   : > { %s968_s6 = smov (!%p173_p3), 88   ;;  %s969_s7 = smov (!%p173_p3), 72  }
   0xa   : > { %v287_v9 = vsub.s32 (!%p173_p3), 0, %v286_v8  ;;  %s970_s8 = smov (!%p173_p3), 80   ;;  %s971_s9 = smov (!%p173_p3), 8  }
   0xb   : > { %s972_s10 = smov (!%p173_p3), 16   ;;  %s973_s11 = smov (!%p173_p3), 24  }
   0xe   : > { %s1119_s12 = smov (!%p207_p4, %s952_s12), 1 }
   0xf   : > { %s1018_s16 = sshll.u32 %s1119_s12, 3  ;;  %s220_s25 = scalar_lea.vmem %s1112_s2, %s1119_s12 }
  0x10   : > { %s217_s19 = scalar_lea.vmem %s1111_s1, %s1018_s16  ;;  %s213_s22 = scalar_lea.vmem %s1110_s0, %s1018_s16  ;;  %v231_v7 = vld [vmem:[%s220_s25] sm:$0x1] }
  0x11   : > { %v230_v1 = vld [vmem:[%s217_s19] sm:$0xff]  ;;  %vm232_vm2 = vcmp.eq.f32.partialorder %v231_v7, 0.0  ;;  %s1070_s5 = scalar_lea.vmem %s1113_s3, %s1018_s16 }
  0x12   : > { %v1024_v2 = vpack.c.bf16 %v230_v1, %v230_v1  ;;  %v229_v4 = vld [vmem:[%s213_s22] sm:$0xff]  ;;  %v233_v10 = vsel %vm232_vm2, -1e+09, %v962_v0 }
  0x13   : > { %v234_v5 = vpack.c.bf16 %v229_v4, %v229_v4  ;;  %v1040_v11 = vrot.slane %v233_v10, %v287_v9 }
  0x14   : > { %v241_v3 = vsel %vm236_vm1, %v1024_v2, 0  ;;  %304 = vrot.lane.b32.xlu1 %v1024_v2, %s964_s26 }
  0x15   : > { %839 = vmatpush3.bf16.xpose.msra.mxu0 %v241_v3 }
  0x16   : > { %856 = vmatprep.subr.bf16.mxu0 %v962_v0 }
  0x18   : > { %357 = vrot.lane.b32.xlu1 %v1024_v2, %s965_s27 }
  0x1c   : > { %841 = vmatmul.mubr.msk.bf16.vlgmr.msra.gmra.mrb[0].mxu0 %vm236_vm1, %v234_v5  ;;  %475 = vrot.lane.b32.xlu1 %v1024_v2, %s966_s28 }
  0x1d   : > { %858 = vmatprep.mubr.msk.bf16.mxu0 %vm963_vm0, %v962_v0 }
  0x20   : > { %473 = vrot.lane.b32.xlu1 %v234_v5, %s966_s28 }
  0x24   : > { %593 = vrot.lane.b32.xlu1 %v1024_v2, %s967_s29 }
  0x28   : > { %591 = vrot.lane.b32.xlu1 %v234_v5, %s967_s29 }
  0x86   : > { %v305_v24 = vpop.permute.xlu1 %304 }
  0x87   : > { %v311_v25 = vsel %vm309_vm3, %v305_v24, 0 }
  0x88   : > { %845 = vmatpush3.bf16.msra.mxu1 %v311_v25 }
  0x89   : > { %850 = vmatprep.subr.bf16.mxu1 %v962_v0 }
  0x8a   : > { %v358_v28 = vpop.permute.xlu1 %357 }
  0x8b   : > { %v363_v30 = vsel %vm236_vm1, %v358_v28, 0 }
  0x8e   : > { %v476_v32 = vpop.permute.xlu1 %475 }
  0x8f   : > { %v481_v35 = vsel %vm236_vm1, %v476_v32, 0 }
  0x92   : > { %v474_v34 = vpop.permute.xlu1 %473 }
  0x96   : > { %v594_v36 = vpop.permute.xlu1 %593 }
  0x97   : > { %v599_v37 = vsel %vm236_vm1, %v594_v36, 0 }
  0x9a   : > { %v592_v38 = vpop.permute.xlu1 %591 }
  0xef   : > { %v277_v12 = vpop.f32.mrb[0].mxu0 }
  0xf0   : > { %v283_v13 = vmul.f32 0.35355338, %v277_v12  ;;  %v842_v14 = vpop.f32.mrb[1].mxu0 }
  0xf1   : > { %v280_v15 = vpop.f32.mrb[2].mxu0 }
  0xf2   : > { %v843_v16 = vpop.f32.mrb[3].mxu0  ;;  %v290_v17 = vadd.f32 %v1040_v11, %v283_v13 }
  0xf4   : > { %v291_v18 = vsel %vm236_vm1, %v290_v17, -inf }
  0xf5   : > { %292 = vmax.xlane.f32.xlu0 %v291_v18 }
 0x182   : > { %v293_v19 = vpop.xlane.xlu0 %292 }
 0x183   : > { %v294_v20 = vsub.f32 %v290_v17, %v293_v19 }
 0x185   : > { %v295_v21 = vmul.f32 1.442695, %v294_v20 }
 0x187   : > { %922 = vpow2.f32 %v295_v21 }
 0x191   : > { %v923_v22 = vpop.eup %922 }
 0x192   : > { %v297_v23 = vsel %vm236_vm1, %v923_v22, 0.0 }
 0x193   : > { %298 = vadd.xlane.f32.xlu0 %v297_v23 }
 0x1a9   : > { %355 = vrot.lane.b32.xlu0 %v234_v5, %s965_s27 }
 0x220   : > { %v299_v26 = vpop.xlane.xlu0 %298 }
 0x221   : > { %924 = vrcp.f32 %v299_v26 }
 0x224   : > { %v356_v33 = vpop.permute.xlu0 %355 }
 0x22b   : > { %v925_v27 = vpop.eup %924 }
 0x22c   : > { %v301_v29 = vmul.f32 %v925_v27, %v923_v22 }
 0x22e   : > { %v302_v31 = vpack.c.bf16 %v301_v29, %v301_v29 }
 0x230   : > { %847 = vmatmul.mubr.msk.bf16.vlgmr.msra.gmra.mrb[0].mxu1 %vm236_vm1, %v302_v31 }
 0x231   : > { %851 = vmatpush3.bf16.xpose.msra.mxu1 %v363_v30  ;;  %852 = vmatprep.mubr.msk.bf16.mxu1 %vm963_vm0, %v962_v0 }
 0x232   : > { %862 = vmatprep.subr.bf16.mxu1 %v962_v0 }
 0x238   : > { %853 = vmatmul.mubr.msk.bf16.vlgmr.msra.gmra.mrb[4].mxu1 %vm236_vm1, %v356_v33 }
 0x239   : > { %863 = vmatpush3.bf16.xpose.msra.mxu1 %v481_v35  ;;  %864 = vmatprep.mubr.msk.bf16.mxu1 %vm963_vm0, %v962_v0 }
 0x23a   : > { %874 = vmatprep.subr.bf16.mxu1 %v962_v0 }
 0x240   : > { %865 = vmatmul.mubr.msk.bf16.vlgmr.msra.gmra.mrb[8].mxu1 %vm236_vm1, %v474_v34 }
 0x241   : > { %875 = vmatpush3.bf16.xpose.msra.mxu1 %v599_v37  ;;  %876 = vmatprep.mubr.msk.bf16.mxu1 %vm963_vm0, %v962_v0 }
 0x248   : > { %877 = vmatmul.mubr.msk.bf16.vlgmr.msra.gmra.mrb[12].mxu1 %vm236_vm1, %v592_v38 }
 0x303   : > { %v347_v39 = vpop.f32.mrb[0].mxu1 }
 0x304   : > { %353 = vst.msk [vmem:[%s1070_s5] sm:$0xff] %vm236_vm1, %v347_v39  ;;  %v848_v40 = vpop.f32.mrb[1].mxu1 }
 0x305   : > { %v350_v41 = vpop.f32.mrb[2].mxu1 }
 0x306   : > { %v849_v42 = vpop.f32.mrb[3].mxu1 }
 0x30b   : > { %v399_v43 = vpop.f32.mrb[4].mxu1 }
 0x30c   : > { %v405_v44 = vmul.f32 0.35355338, %v399_v43  ;;  %v854_v45 = vpop.f32.mrb[5].mxu1 }
 0x30d   : > { %v402_v46 = vpop.f32.mrb[6].mxu1 }
 0x30e   : > { %v855_v47 = vpop.f32.mrb[7].mxu1  ;;  %v406_v48 = vadd.f32 %v405_v44, %v1040_v11 }
 0x310   : > { %v407_v49 = vsel %vm236_vm1, %v406_v48, -inf }
 0x311   : > { %408 = vmax.xlane.f32.xlu1 %v407_v49 }
 0x313   : > { %v517_v50 = vpop.f32.mrb[8].mxu1 }
 0x314   : > { %v523_v51 = vmul.f32 0.35355338, %v517_v50  ;;  %v866_v52 = vpop.f32.mrb[9].mxu1 }
 0x315   : > { %v520_v53 = vpop.f32.mrb[10].mxu1 }
 0x316   : > { %v867_v54 = vpop.f32.mrb[11].mxu1  ;;  %v524_v55 = vadd.f32 %v523_v51, %v1040_v11 }
 0x318   : > { %v525_v56 = vsel %vm236_vm1, %v524_v55, -inf }
 0x319   : > { %526 = vmax.xlane.f32.xlu0 %v525_v56 }
 0x31b   : > { %v635_v57 = vpop.f32.mrb[12].mxu1 }
 0x31c   : > { %v641_v58 = vmul.f32 0.35355338, %v635_v57  ;;  %v878_v59 = vpop.f32.mrb[13].mxu1 }
 0x31d   : > { %v638_v60 = vpop.f32.mrb[14].mxu1 }
 0x31e   : > { %v879_v61 = vpop.f32.mrb[15].mxu1  ;;  %v642_v62 = vadd.f32 %v641_v58, %v1040_v11 }
 0x320   : > { %v643_v63 = vsel %vm236_vm1, %v642_v62, -inf }
 0x321   : > { %644 = vmax.xlane.f32.xlu1 %v643_v63 }
 0x332   : > { %419 = vrot.lane.b32.xlu1 %v1024_v2, %s968_s6 }
 0x39e   : > { %v409_v1 = vpop.xlane.xlu1 %408 }
 0x39f   : > { %v410_v3 = vsub.f32 %v406_v48, %v409_v1 }
 0x3a1   : > { %v411_v4 = vmul.f32 1.442695, %v410_v3 }
 0x3a3   : > { %926 = vpow2.f32 %v411_v4 }
 0x3a6   : > { %v527_v5 = vpop.xlane.xlu0 %526 }
 0x3a7   : > { %v528_v6 = vsub.f32 %v524_v55, %v527_v5 }
 0x3a9   : > { %v529_v7 = vmul.f32 1.442695, %v528_v6 }
 0x3ab   : > { %928 = vpow2.f32 %v529_v7 }
 0x3ad   : > { %v927_v8 = vpop.eup %926 }
 0x3ae   : > { %v645_v9 = vpop.xlane.xlu1 %644  ;;  %v413_v10 = vsel %vm236_vm1, %v927_v8, 0.0 }
 0x3af   : > { %v646_v12 = vsub.f32 %v642_v62, %v645_v9  ;;  %414 = vadd.xlane.f32.xlu0 %v413_v10 }
 0x3b1   : > { %v647_v11 = vmul.f32 1.442695, %v646_v12 }
 0x3b2   : > { %v420_v13 = vpop.permute.xlu1 %419 }
 0x3b3   : > { %930 = vpow2.f32 %v647_v11  ;;  %v425_v14 = vsel %vm309_vm3, %v420_v13, 0 }
 0x3b4   : > { %857 = vmatpush3.bf16.msra.mxu0 %v425_v14 }
 0x3b5   : > { %v929_v15 = vpop.eup %928  ;;  %868 = vmatprep.subr.bf16.mxu0 %v962_v0 }
 0x3b6   : > { %v531_v16 = vsel %vm236_vm1, %v929_v15, 0.0 }
 0x3b7   : > { %532 = vadd.xlane.f32.xlu1 %v531_v16 }
 0x3bd   : > { %v931_v17 = vpop.eup %930 }
 0x3be   : > { %v649_v18 = vsel %vm236_vm1, %v931_v17, 0.0 }
 0x3bf   : > { %650 = vadd.xlane.f32.xlu0 %v649_v18 }
 0x3c8   : > { %655 = vrot.lane.b32.xlu1 %v1024_v2, %s969_s7 }
 0x3d5   : > { %537 = vrot.lane.b32.xlu0 %v1024_v2, %s970_s8 }
 0x43c   : > { %v415_v19 = vpop.xlane.xlu0 %414 }
 0x43d   : > { %932 = vrcp.f32 %v415_v19 }
 0x444   : > { %v533_v20 = vpop.xlane.xlu1 %532 }
 0x445   : > { %934 = vrcp.f32 %v533_v20 }
 0x447   : > { %v933_v21 = vpop.eup %932 }
 0x448   : > { %v417_v22 = vmul.f32 %v933_v21, %v927_v8  ;;  %v656_v28 = vpop.permute.xlu1 %655 }
 0x449   : > { %v661_v30 = vsel %vm309_vm3, %v656_v28, 0 }
 0x44a   : > { %v418_v23 = vpack.c.bf16 %v417_v22, %v417_v22 }
 0x44c   : > { %v651_v24 = vpop.xlane.xlu0 %650  ;;  %859 = vmatmul.mubr.msk.bf16.vlgmr.msra.gmra.mrb[4].mxu0 %vm236_vm1, %v418_v23 }
 0x44d   : > { %936 = vrcp.f32 %v651_v24  ;;  %870 = vmatprep.mubr.msk.bf16.mxu0 %vm963_vm0, %v962_v0 }
 0x44f   : > { %v935_v25 = vpop.eup %934 }
 0x450   : > { %v535_v26 = vmul.f32 %v935_v25, %v929_v15  ;;  %v538_v27 = vpop.permute.xlu0 %537 }
 0x451   : > { %v543_v2 = vsel %vm309_vm3, %v538_v27, 0 }
 0x452   : > { %869 = vmatpush3.bf16.msra.mxu0 %v543_v2  ;;  %v536_v29 = vpack.c.bf16 %v535_v26, %v535_v26 }
 0x453   : > { %880 = vmatprep.subr.bf16.mxu0 %v962_v0 }
 0x455   : > { %871 = vmatmul.mubr.msk.bf16.vlgmr.msra.gmra.mrb[8].mxu0 %vm236_vm1, %v536_v29 }
 0x456   : > { %881 = vmatpush3.bf16.msra.mxu0 %v661_v30  ;;  %882 = vmatprep.mubr.msk.bf16.mxu0 %vm963_vm0, %v962_v0 }
 0x457   : > { %v937_v31 = vpop.eup %936 }
 0x458   : > { %v653_v32 = vmul.f32 %v937_v31, %v931_v17 }
 0x45a   : > { %v654_v33 = vpack.c.bf16 %v653_v32, %v653_v32 }
 0x45d   : > { %883 = vmatmul.mubr.msk.bf16.vlgmr.msra.gmra.mrb[12].mxu0 %vm236_vm1, %v654_v33 }
 0x51f   : > { %v461_v34 = vpop.f32.mrb[4].mxu0 }
 0x520   : > { %468 = vrot.lane.b32.xlu1 %v461_v34, %s971_s9  ;;  %v860_v35 = vpop.f32.mrb[5].mxu0 }
 0x521   : > { %v464_v36 = vpop.f32.mrb[6].mxu0 }
 0x522   : > { %v861_v37 = vpop.f32.mrb[7].mxu0 }
 0x528   : > { %v579_v38 = vpop.f32.mrb[8].mxu0 }
 0x529   : > { %586 = vrot.lane.b32.xlu0 %v579_v38, %s972_s10  ;;  %v872_v39 = vpop.f32.mrb[9].mxu0 }
 0x52a   : > { %v582_v40 = vpop.f32.mrb[10].mxu0 }
 0x52b   : > { %v873_v0 = vpop.f32.mrb[11].mxu0 }
 0x530   : > { %v697_v41 = vpop.f32.mrb[12].mxu0 }
 0x531   : > { %704 = vrot.lane.b32.xlu1 %v697_v41, %s973_s11  ;;  %v884_v42 = vpop.f32.mrb[13].mxu0 }
 0x532   : > { %v700_v43 = vpop.f32.mrb[14].mxu0 }
 0x533   : > { %v885_v44 = vpop.f32.mrb[15].mxu0 }
 0x592   : > { %v469_v45 = vpop.permute.xlu1 %468 }
 0x593   : > { %472 = vst.msk [vmem:[%s1070_s5] sm:$0xff] %vm471_vm4, %v469_v45 }
 0x59b   : > { %v587_v46 = vpop.permute.xlu0 %586 }
 0x59c   : > { %590 = vst.msk [vmem:[%s1070_s5] sm:$0xff] %vm589_vm5, %v587_v46 }
 0x5a3   : > { %v705_v47 = vpop.permute.xlu1 %704 }
 0x5a4   : > { %708 = vst.msk [vmem:[%s1070_s5] sm:$0xff] %vm707_vm6, %v705_v47 }
 0x5a5 PF: > { %s13_s14 = sadd.s32 1, %s960_s14   ;;  %s1114_s12 = smov %s956_s13 }
 0x5a6   : > { %p10_p5 = scmp.ge.s32.totalorder %s13_s14, 4   ;;  %s1115_s13 = smov %s1117_s15 }
 0x5a8   :  { %12 = sbr.rel (!%p10_p5) target bundleno = 2 (0x2), region = 68 }

// kernel: decoder_forward.25
= control target key start
LH: loop header
LB: loop body
LE: loop exit
PB: predicated region body
PF: predicated region fallthrough
CT: control target
= control target key end

     0   :  { %vm27_vm0 = vcmask 261120   ;;  %v199_v14 = vmov 0.0   ;;  %vm200_vm1 = vmmov 0   ;;  %vm163_vm6 = vcmask 523264   ;;  %s265_s0 = inlined_call_operand.vmem [shape: f32[16,32], index: 0, kind: input, shape index: {}]   ;;  %s266_s3 = inlined_call_operand.vmem [shape: bf16[32,64], index: 3, kind: input, shape index: {}]   ;;  %s267_s1 = inlined_call_operand.vmem [shape: f32[1,32], index: 1, kind: input, shape index: {}]   ;;  %s268_s2 = inlined_call_operand.vmem [shape: f32[1,32], index: 2, kind: input, shape index: {}]   ;;  %s269_s4 = inlined_call_operand.vmem [shape: f32[1,64], index: 4, kind: input, shape index: {}]   ;;  %s270_s5 = inlined_call_operand.vmem [shape: f32[16,64], index: 5, kind: output, shape index: {}]  }
   0x1   :  { %v25_v0 = vld [vmem:[%s265_s0] sm:$0xff]  ;;  %v26_v1 = vld [vmem:[%s265_s0 + $0x8] sm:$0xff]  ;;  %179 = vmatprep.subr.bf16.mxu0 %v199_v14  ;;  %183 = vmatprep.mubr.msk.bf16.mxu0 %vm200_vm1, %v199_v14 }
   0x2   :  { %v28_v2 = vsel %vm27_vm0, %v25_v0, 0.0  ;;  %v31_v3 = vsel %vm27_vm0, %v26_v1, 0.0  ;;  %v189_v15 = vld [vmem:[%s266_s3] sm:$0xff]   ;;  %v190_v16 = vld [vmem:[%s266_s3 + $0x8] sm:$0xff]  }
   0x3   :  { %29 = vadd.xlane.f32.xlu0 %v28_v2  ;;  %180 = vmatpush3.bf16.msra.mxu0 %v189_v15  ;;  %v170_v33 = vld [vmem:[%s267_s1] ss:$0 sm:$0xff] }
   0x4   :  { %181 = vmatprep.subr.bf16.mxu0 %v199_v14  ;;  %v171_v36 = vld [vmem:[%s268_s2] ss:$0 sm:$0xff] }
   0x5   :  { %v172_v46 = vld [vmem:[%s269_s4] ss:$0 sm:$0xff] }
   0x7   :  { %32 = vadd.xlane.f32.xlu0 %v31_v3  ;;  %182 = vmatpush3.bf16.msra.mxu0 %v190_v16 }
  0x90   :  { %v30_v4 = vpop.xlane.xlu0 %29 }
  0x91   :  { %v35_v5 = vmul.f32 0.03125, %v30_v4 }
  0x93   :  { %v37_v6 = vsub.f32 %v25_v0, %v35_v5 }
  0x94   :  { %v33_v7 = vpop.xlane.xlu0 %32 }
  0x95   :  { %v36_v8 = vmul.f32 0.03125, %v33_v7  ;;  %v39_v9 = vmul.f32 %v37_v6, %v37_v6  ;;  %v75_v34 = vmul.f32 %v170_v33, %v37_v6 }
  0x97   :  { %v38_v10 = vsub.f32 %v26_v1, %v36_v8  ;;  %v41_v11 = vsel %vm27_vm0, %v39_v9, 0.0 }
  0x98   :  { %42 = vadd.xlane.f32.xlu1 %v41_v11 }
  0x99   :  { %v40_v12 = vmul.f32 %v38_v10, %v38_v10  ;;  %v76_v38 = vmul.f32 %v170_v33, %v38_v10 }
  0x9b   :  { %v44_v13 = vsel %vm27_vm0, %v40_v12, 0.0 }
  0x9c   :  { %45 = vadd.xlane.f32.xlu1 %v44_v13 }
 0x125   :  { %v43_v17 = vpop.xlane.xlu1 %42 }
 0x126   :  { %v48_v18 = vmul.f32 0.032258064, %v43_v17 }
 0x128   :  { %191 = vrsqrt.f32 %v48_v18  ;;  %vm52_vm2 = vcmp.eq.f32.partialorder %v48_v18, inf  ;;  %v55_v23 = vand.u32 2147483648, %v48_v18  ;;  %vm54_vm3 = vcmp.eq.f32.partialorder %v48_v18, 0.0 }
 0x129   :  { %v46_v19 = vpop.xlane.xlu1 %45 }
 0x12a   :  { %v49_v20 = vmul.f32 0.032258064, %v46_v19 }
 0x12c   :  { %193 = vrsqrt.f32 %v49_v20  ;;  %vm59_vm4 = vcmp.eq.f32.partialorder %v49_v20, inf  ;;  %v62_v29 = vand.u32 2147483648, %v49_v20  ;;  %vm61_vm5 = vcmp.eq.f32.partialorder %v49_v20, 0.0 }
 0x132   :  { %v192_v21 = vpop.eup %191 }
 0x133   :  { %v51_v22 = vmul.f32 %v192_v21, %v48_v18 }
 0x135   :  { %v53_v24 = vsel %vm52_vm2, %v48_v18, %v51_v22 }
 0x136   :  { %v194_v25 = vpop.eup %193  ;;  %v56_v26 = vsel %vm54_vm3, %v55_v23, %v53_v24 }
 0x137   :  { %v64_v27 = vadd.f32 1e-06, %v56_v26  ;;  %v58_v28 = vmul.f32 %v194_v25, %v49_v20 }
 0x139   :  { %195 = vrcp.f32 %v64_v27  ;;  %v60_v30 = vsel %vm59_vm4, %v49_v20, %v58_v28 }
 0x13a   :  { %v63_v31 = vsel %vm61_vm5, %v62_v29, %v60_v30 }
 0x13b   :  { %v65_v32 = vadd.f32 1e-06, %v63_v31 }
 0x13d   :  { %197 = vrcp.f32 %v65_v32 }
 0x143   :  { %v196_v35 = vpop.eup %195 }
 0x144   :  { %v77_v37 = vmul.f32 %v196_v35, %v75_v34 }
 0x146   :  { %v86_v39 = vadd.f32 %v171_v36, %v77_v37 }
 0x147   :  { %v198_v40 = vpop.eup %197 }
 0x148   :  { %88 = vst.msk [vmem:[#allocation2] sm:$0xff] %vm27_vm0, %v86_v39  ;;  %v78_v41 = vmul.f32 %v198_v40, %v76_v38 }
 0x14a   :  { %v87_v42 = vadd.f32 %v171_v36, %v78_v41 }
 0x14c   :  { %89 = vst.msk [vmem:[#allocation2 + $0x8] sm:$0xff] %vm27_vm0, %v87_v42 }
 0x14f   :  { %v90_v43 = vld [vmem:[#allocation2] sm:$0xff] }
 0x153   :  { %v91_v44 = vld [vmem:[#allocation2 + $0x8] sm:$0xff] }
 0x154   :  { %v92_v45 = vpack.c.bf16 %v91_v44, %v90_v43 }
 0x156   :  { %184 = vmatmul.mubr.msk.bf16.vlgmr.msra.gmra.mrb[0].mxu0 %vm27_vm0, %v92_v45 }
 0x229   :  { %v154_v47 = vpop.f32.mrb[0].mxu0 }
 0x22a   :  { %v155_v48 = vadd.f32 %v172_v46, %v154_v47  ;;  %v185_v49 = vpop.f32.mrb[1].mxu0 }
 0x22b   :  { %v157_v50 = vpop.f32.mrb[2].mxu0 }
 0x22c   :  { %v161_v51 = vmax.f32 %v155_v48, 0.0  ;;  %v158_v52 = vadd.f32 %v172_v46, %v157_v50  ;;  %v186_v53 = vpop.f32.mrb[3].mxu0 }
 0x22e   :  { %164 = vst.msk [vmem:[%s270_s5] sm:$0xff] %vm163_vm6, %v161_v51  ;;  %v162_v54 = vmax.f32 %v158_v52, 0.0 }
 0x230   :  { %165 = vst.msk [vmem:[%s270_s5 + $0x8] sm:$0xff] %vm163_vm6, %v162_v54 }

// kernel: decoder_forward.26
= control target key start
LH: loop header
LB: loop body
LE: loop exit
PB: predicated region body
PF: predicated region fallthrough
CT: control target
= control target key end

     0   :  { %v145_v0 = vmov 0.0   ;;  %vm146_vm0 = vmmov 0   ;;  %vm60_vm1 = vcmask 523264   ;;  %vm109_vm2 = vcmask 261120   ;;  %s205_s1 = inlined_call_operand.vmem [shape: bf16[64,32], index: 1, kind: input, shape index: {}]   ;;  %s206_s0 = inlined_call_operand.vmem [shape: f32[16,64], index: 0, kind: input, shape index: {}]   ;;  %s207_s2 = inlined_call_operand.vmem [shape: f32[1,32], index: 2, kind: input, shape index: {}]   ;;  %s208_s3 = inlined_call_operand.vmem [shape: f32[16,32], index: 3, kind: input, shape index: {}]   ;;  %s209_s4 = inlined_call_operand.vmem [shape: f32[16,32], index: 4, kind: output, shape index: {}]  }
   0x1   :  { %127 = vmatprep.subr.bf16.mxu0 %v145_v0  ;;  %v141_v1 = vld [vmem:[%s205_s1] sm:$0xff]   ;;  %135 = vmatprep.mubr.msk.bf16.mxu0 %vm146_vm0, %v145_v0  ;;  %v142_v2 = vld [vmem:[%s205_s1 + $0x8] sm:$0xff]   ;;  %v143_v3 = vld [vmem:[%s205_s1 + $0x10] sm:$0xff]  }
   0x2   :  { %128 = vmatpush3.bf16.msra.mxu0 %v141_v1  ;;  %v144_v4 = vld [vmem:[%s205_s1 + $0x18] sm:$0xff]   ;;  %v18_v5 = vld [vmem:[%s206_s0] sm:$0xff]  ;;  %v19_v6 = vld [vmem:[%s206_s0 + $0x8] sm:$0xff] }
   0x3   :  { %129 = vmatprep.subr.bf16.mxu0 %v145_v0  ;;  %v20_v7 = vpack.c.bf16 %v19_v6, %v18_v5  ;;  %v116_v8 = vld [vmem:[%s207_s2] ss:$0 sm:$0xff]  ;;  %v106_v14 = vld [vmem:[%s208_s3 + $0x8] sm:$0xff] }
   0x4   :  { %v105_v10 = vld [vmem:[%s208_s3] sm:$0xff] }
   0x6   :  { %130 = vmatpush3.bf16.msra.mxu0 %v142_v2 }
   0x7   :  { %131 = vmatprep.subr.bf16.mxu0 %v145_v0 }
   0xa   :  { %132 = vmatpush3.bf16.msra.mxu0 %v143_v3 }
   0xb   :  { %133 = vmatprep.subr.bf16.mxu0 %v145_v0 }
   0xe   :  { %134 = vmatpush3.bf16.msra.mxu0 %v144_v4 }
  0x11   :  { %136 = vmatmul.mubr.msk.bf16.vlgmr.msra.gmra.mrb[0].mxu0 %vm60_vm1, %v20_v7 }
  0xe4   :  { %v98_v9 = vpop.f32.mrb[0].mxu0 }
  0xe5   :  { %v99_v11 = vadd.f32 %v116_v8, %v98_v9  ;;  %v137_v12 = vpop.f32.mrb[1].mxu0 }
  0xe6   :  { %v101_v13 = vpop.f32.mrb[2].mxu0 }
  0xe7   :  { %v107_v15 = vadd.f32 %v105_v10, %v99_v11  ;;  %v102_v16 = vadd.f32 %v116_v8, %v101_v13  ;;  %v138_v17 = vpop.f32.mrb[3].mxu0 }
  0xe9   :  { %110 = vst.msk [vmem:[%s209_s4] sm:$0xff] %vm109_vm2, %v107_v15  ;;  %v108_v18 = vadd.f32 %v106_v14, %v102_v16 }
  0xeb   :  { %111 = vst.msk [vmem:[%s209_s4 + $0x8] sm:$0xff] %vm109_vm2, %v108_v18 }

// kernel: decoder_forward.35
= control target key start
LH: loop header
LB: loop body
LE: loop exit
PB: predicated region body
PF: predicated region fallthrough
CT: control target
= control target key end

     0   :  { %v261_v1 = vmov 0.0   ;;  %vm262_vm0 = vmmov 0   ;;  %s352_s0 = inlined_call_operand.vmem [shape: f32[16,64], index: 0, kind: input, shape index: {}]   ;;  %s353_s1 = inlined_call_operand.vmem [shape: bf16[64,32], index: 1, kind: input, shape index: {}]   ;;  %s354_s2 = inlined_call_operand.vmem [shape: f32[1,32], index: 2, kind: input, shape index: {}]   ;;  %s355_s3 = inlined_call_operand.vmem [shape: f32[16,32], index: 3, kind: input, shape index: {}]   ;;  %s356_s4 = inlined_call_operand.vmem [shape: f32[1,32], index: 4, kind: input, shape index: {}]   ;;  %s357_s5 = inlined_call_operand.vmem [shape: f32[1,32], index: 5, kind: input, shape index: {}]   ;;  %s358_s6 = inlined_call_operand.hbm [shape: f32[16,32], index: 6, kind: output, shape index: {}]  }
   0x1   :  { %v225_v0 = vld [vmem:[%s353_s1] sm:$0xff]   ;;  %208 = vmatprep.subr.bf16.mxu0 %v261_v1  ;;  %v226_v2 = vld [vmem:[%s353_s1 + $0x8] sm:$0xff]   ;;  %216 = vmatprep.mubr.msk.bf16.mxu0 %vm262_vm0, %v261_v1 }
   0x2   :  { %209 = vmatpush3.bf16.msra.mxu0 %v225_v0 }
   0x3   :  { %210 = vmatprep.subr.bf16.mxu0 %v261_v1 }
   0x4   :  { %11 = vsyncpa [#allocation3], 0  ;;  %v227_v3 = vld [vmem:[%s353_s1 + $0x10] sm:$0xff]   ;;  %v228_v4 = vld [vmem:[%s353_s1 + $0x18] sm:$0xff]   ;;  %vm67_vm1 = vcmask 523264   ;;  %vm116_vm2 = vcmask 261120  }
   0x5   :  { %v25_v5 = vld [vmem:[%s352_s0] sm:$0xff]  ;;  %v26_v6 = vld [vmem:[%s352_s0 + $0x8] sm:$0xff]  ;;  %s263_s15 = smov [#allocation2]  }
   0x6   :  { %211 = vmatpush3.bf16.msra.mxu0 %v226_v2  ;;  %v27_v7 = vpack.c.bf16 %v26_v6, %v25_v5  ;;  %v195_v8 = vld [vmem:[%s354_s2] ss:$0 sm:$0xff]  ;;  %v113_v14 = vld [vmem:[%s355_s3 + $0x8] sm:$0xff]  ;;  %s184_s16 = sshll.u32 %s263_s15, 4  ;;  %s185_s16 = int_to_ptr.vmem [resolvable:$true] %s184_s16 }
   0x7   :  { %212 = vmatprep.subr.bf16.mxu0 %v261_v1  ;;  %v112_v10 = vld [vmem:[%s355_s3] sm:$0xff]  ;;  %p242_p1 = scmp.lt.s32.totalorder %s185_s16, %s185_s16 }
   0x8   :  { %v201_v47 = vld [vmem:[%s356_s4] ss:$0 sm:$0xff]  ;;  %s237_s4 = scalar_lea.vmem %s185_s16, 256 }
   0x9   :  { %v202_v50 = vld [vmem:[%s357_s5] ss:$0 sm:$0xff]  ;;  %p238_p0 = scmp.ne.s32.totalorder %s185_s16, %s237_s4  ;;  %p243_p2 = scmp.lt.s32.totalorder %s237_s4, %s237_s4 }
   0xa   :  { %213 = vmatpush3.bf16.msra.mxu0 %v227_v3 }
   0xb   :  { %214 = vmatprep.subr.bf16.mxu0 %v261_v1  ;;  %p244_p3 = por %p243_p2, %p242_p1 }
   0xd   :  { %p245_p4 = pnand %p244_p3, %p238_p0 }
   0xe   :  { %215 = vmatpush3.bf16.msra.mxu0 %v228_v4 }
  0x11   :  { %217 = vmatmul.mubr.msk.bf16.vlgmr.msra.gmra.mrb[0].mxu0 %vm67_vm1, %v27_v7 }
  0xe4   :  { %v105_v9 = vpop.f32.mrb[0].mxu0 }
  0xe5   :  { %v106_v11 = vadd.f32 %v195_v8, %v105_v9  ;;  %v218_v12 = vpop.f32.mrb[1].mxu0 }
  0xe6   :  { %v108_v13 = vpop.f32.mrb[2].mxu0 }
  0xe7   :  { %v109_v15 = vadd.f32 %v195_v8, %v108_v13  ;;  %v219_v16 = vpop.f32.mrb[3].mxu0  ;;  %v114_v17 = vadd.f32 %v112_v10, %v106_v11 }
  0xe9   :  { %v117_v18 = vsel %vm116_vm2, %v114_v17, 0.0  ;;  %v115_v19 = vadd.f32 %v113_v14, %v109_v15 }
  0xea   :  { %118 = vadd.xlane.f32.xlu0 %v117_v18 }
  0xeb   :  { %v120_v20 = vsel %vm116_vm2, %v115_v19, 0.0 }
  0xee   :  { %121 = vadd.xlane.f32.xlu0 %v120_v20 }
 0x177   :  { %v119_v21 = vpop.xlane.xlu0 %118 }
 0x178   :  { %v124_v22 = vmul.f32 0.03125, %v119_v21 }
 0x17a   :  { %v126_v23 = vsub.f32 %v114_v17, %v124_v22 }
 0x17b   :  { %v122_v24 = vpop.xlane.xlu0 %121 }
 0x17c   :  { %v125_v25 = vmul.f32 0.03125, %v122_v24  ;;  %v128_v26 = vmul.f32 %v126_v23, %v126_v23  ;;  %v164_v48 = vmul.f32 %v201_v47, %v126_v23 }
 0x17e   :  { %v127_v27 = vsub.f32 %v115_v19, %v125_v25  ;;  %v130_v28 = vsel %vm116_vm2, %v128_v26, 0.0 }
 0x17f   :  { %131 = vadd.xlane.f32.xlu1 %v130_v28 }
 0x180   :  { %v129_v29 = vmul.f32 %v127_v27, %v127_v27  ;;  %v165_v52 = vmul.f32 %v201_v47, %v127_v27 }
 0x182   :  { %v133_v30 = vsel %vm116_vm2, %v129_v29, 0.0 }
 0x183   :  { %134 = vadd.xlane.f32.xlu1 %v133_v30 }
 0x20c   :  { %v132_v31 = vpop.xlane.xlu1 %131 }
 0x20d   :  { %v137_v32 = vmul.f32 0.032258064, %v132_v31 }
 0x20f   :  { %229 = vrsqrt.f32 %v137_v32  ;;  %vm141_vm3 = vcmp.eq.f32.partialorder %v137_v32, inf  ;;  %v144_v37 = vand.u32 2147483648, %v137_v32  ;;  %vm143_vm4 = vcmp.eq.f32.partialorder %v137_v32, 0.0 }
 0x210   :  { %v135_v33 = vpop.xlane.xlu1 %134 }
 0x211   :  { %v138_v34 = vmul.f32 0.032258064, %v135_v33 }
 0x213   :  { %231 = vrsqrt.f32 %v138_v34  ;;  %vm148_vm5 = vcmp.eq.f32.partialorder %v138_v34, inf  ;;  %v151_v43 = vand.u32 2147483648, %v138_v34  ;;  %vm150_vm6 = vcmp.eq.f32.partialorder %v138_v34, 0.0 }
 0x219   :  { %v230_v35 = vpop.eup %229 }
 0x21a   :  { %v140_v36 = vmul.f32 %v230_v35, %v137_v32 }
 0x21c   :  { %v142_v38 = vsel %vm141_vm3, %v137_v32, %v140_v36 }
 0x21d   :  { %v232_v39 = vpop.eup %231  ;;  %v145_v40 = vsel %vm143_vm4, %v144_v37, %v142_v38 }
 0x21e   :  { %v153_v41 = vadd.f32 1e-06, %v145_v40  ;;  %v147_v42 = vmul.f32 %v232_v39, %v138_v34 }
 0x220   :  { %233 = vrcp.f32 %v153_v41  ;;  %v149_v44 = vsel %vm148_vm5, %v138_v34, %v147_v42 }
 0x221   :  { %v152_v45 = vsel %vm150_vm6, %v151_v43, %v149_v44 }
 0x222   :  { %v154_v46 = vadd.f32 1e-06, %v152_v45 }
 0x224   :  { %235 = vrcp.f32 %v154_v46 }
 0x22a   :  { %v234_v49 = vpop.eup %233 }
 0x22b   :  { %v166_v51 = vmul.f32 %v234_v49, %v164_v48 }
 0x22d   :  { %v175_v53 = vadd.f32 %v202_v50, %v166_v51 }
 0x22e   :  { %v236_v54 = vpop.eup %235 }
 0x22f   :  { %v167_v55 = vmul.f32 %v236_v54, %v165_v52  ;;  %177 = vst.msk [vmem:[#allocation2] sm:$0xff] %vm116_vm2, %v175_v53 }
 0x231   :  { %v176_v56 = vadd.f32 %v202_v50, %v167_v55 }
 0x233   :  { %178 = vst.msk [vmem:[#allocation2 + $0x8] sm:$0xff] %vm116_vm2, %v176_v56 }
 0x234   :  { %248 = shalt.err (!%p245_p4)
}
 0x235   :  { %s249_s18 = scalar_lea.hbm %s358_s6, 256 }
 0x236   :  { %p250_p5 = scmp.ne.s32.totalorder %s358_s6, %s249_s18  ;;  %p253_p6 = scmp.lt.u32.totalorder %s249_s18, %s358_s6 }
 0x238   :  { %p255_p7 = pnand %p253_p6, %p250_p5 }
 0x23a   :  { %258 = shalt.err (!%p255_p7)
}
 0x23b   :  { %s264_s23 = smov 128   ;;  %s265_s24 = smov 8  }
 0x23c   :  { %190 = dma.vmem_to_hbm [thread:$0]  %s185_s16, 256, %s358_s6, [#allocation3], %s264_s23, %s264_s23, %s265_s24  }
 0x23d   :  { %259 = dma.done.wait [#allocation3], 256  }
 0x23e   :  { %260 = vsyncadd [#allocation3], 4294967040 }
 0x23f   :  { %194 = vsyncpa [#allocation3], 1 }

</bundles_post_ra>
